<compile_context>
chip_gen: v5e
topology: v5e:2x2
jax: 0.10.0
libtpu: 0.0.40
codegen_flags: <defaults>
</compile_context>

<pallas_src>
import functools
import numpy as np
import jax
import jax.numpy as jnp
from jax import lax
from jax.experimental import pallas as pl
from jax.experimental.pallas import tpu as pltpu


def _round_up(v, m):
    return (v + m - 1) // m * m


def _hdec_kernel(xc_ref, wrw_ref, brw_ref, g1_ref, b1_ref,
                 wab_ref, btr_ref, g2_ref, b2_ref,
                 out_ref, *, chin, chout, Fq, T, Tl, S, last):
    f32 = jnp.float32
    eps = 1e-5
    N = Fq * Tl                        # flattened (freq, lane-padded time) extent
    SC = S * chout                     # polyphase-grouped conv_tr rows
    Lz = (Fq + 1) * Tl                 # output lane extent (Fq+1 groups)

    # validity mask built in-kernel (no DMA'd mask input): 1 where the lane is
    # a real time frame, 0 on the lane padding T..Tl-1 of each frequency row.
    col = lax.broadcasted_iota(jnp.int32, (1, Lz), 1)
    mask_lz = ((col % Tl) < T).astype(f32)                    # (1, Lz)
    mask_n = mask_lz[:, :N]                                   # (1, N)

    # ---- rewrite Conv2d(chin, 2*chin, 3x3, pad 1): ONE im2col matmul --------
    h = jnp.dot(wrw_ref[...], xc_ref[0],
                preferred_element_type=f32) + brw_ref[...]    # (2chin, N)

    # ---- norm1 GroupNorm(1, 2*chin): masked stats, folded scale/shift -------
    cnt1 = float(2 * chin * Fq * T)
    hm = h * mask_n
    s1 = jnp.sum(hm, axis=-1, keepdims=True)                  # (2chin, 1)
    s2 = jnp.sum(hm * hm, axis=-1, keepdims=True)
    mu1 = jnp.sum(s1) / cnt1
    var1 = jnp.maximum(jnp.sum(s2) / cnt1 - mu1 * mu1, 0.0)
    a1 = g1_ref[...] * lax.rsqrt(var1 + eps)                  # (2chin, 1)
    c1 = b1_ref[...] - mu1 * a1
    hn = h * a1 + c1

    # ---- GLU over the channel dimension; cast to bf16 for the MXU -----------
    y = (hn[:chin] * jax.nn.sigmoid(hn[chin:])).astype(jnp.bfloat16)  # (chin, N)

    # ---- conv_tr (K = 2S polyphase): one stacked matmul + aligned combine ----
    # output row fo = q*S + r gets Wt[r] @ y[q]  +  Wt[r+S] @ y[q-1]
    ab = jnp.dot(wab_ref[...], y, preferred_element_type=f32)         # (2SC, N)
    segs = [ab[:SC, :Tl]]                                     # group 0: A only
    if Fq > 1:
        segs.append(ab[:SC, Tl:] + ab[SC:, :N - Tl])          # groups 1..Fq-1
    segs.append(ab[SC:, N - Tl:])                             # group Fq: B only
    z = jnp.concatenate(segs, axis=-1) + btr_ref[...]         # (SC, Lz)

    # ---- norm2 GroupNorm(1, chout) over FULL (uncropped) conv_tr output -----
    cnt2 = float(SC * (Fq + 1) * T)
    zm = z * mask_lz
    t1 = jnp.sum(zm, axis=-1, keepdims=True)
    t2 = jnp.sum(zm * zm, axis=-1, keepdims=True)
    mu2 = jnp.sum(t1) / cnt2
    var2 = jnp.maximum(jnp.sum(t2) / cnt2 - mu2 * mu2, 0.0)
    a2 = g2_ref[...] * lax.rsqrt(var2 + eps)                  # (SC, 1)
    c2 = b2_ref[...] - mu2 * a2
    z = z * a2 + c2
    if not last:
        # exact-erf GELU to match PyTorch F.gelu default numerics.
        z = 0.5 * z * (1.0 + lax.erf(z * 0.7071067811865476))
    out_ref[0] = z.astype(out_ref.dtype)                      # single final store


def hdec_layer_forward(x, skip, length, params, *, chin, chout,
                       kernel_size=8, stride=4, context=1, last=False):
    """freq=True decoder layer. `length` is unused in the freq branch."""
    del length
    if x.ndim == 3:                    # mirrors PyTorch: x.view(B, self.chin, -1, T)
        B3, _, T3 = x.shape
        x = x.reshape(B3, chin, -1, T3)

    B, cx, Fq, T = x.shape
    assert cx + skip.shape[1] == chin
    K, S, ctx = kernel_size, stride, context
    assert K == 2 * S, "this kernel requires kernel_size == 2 * stride"
    pad = (K - S) // 2
    ctaps = 1 + 2 * ctx
    Kc = ctaps * ctaps * chin          # im2col contraction width
    Tl = _round_up(T, 128)             # 128-dense lanes per frequency row
    N = Fq * Tl
    Fo = (Fq + 1) * S                  # == (Fq - 1) * S + K
    Fout = Fo - 2 * pad
    SC = S * chout
    Lz = (Fq + 1) * Tl

    # ---- glue: concat skip, pad by context, im2col taps, flatten to lanes ----
    xcat = jnp.concatenate([x, skip], axis=1)                         # (B, chin, Fq, T)
    xpad = jnp.pad(xcat, ((0, 0), (0, 0), (ctx, ctx), (ctx, ctx)))    # (B, chin, Fq+2, T+2)
    cols = [xpad[:, :, kf:kf + Fq, kt:kt + T]
            for kf in range(ctaps) for kt in range(ctaps)]
    xcol = jnp.concatenate(cols, axis=1)                              # (B, Kc, Fq, T)
    xcol = jnp.pad(xcol, ((0, 0), (0, 0), (0, 0), (0, Tl - T)))       # zero lane pad
    xcol = xcol.reshape(B, Kc, N).astype(jnp.bfloat16)

    # ---- parameter layout massaging (glue) ----------------------------------
    # weight rows ordered (kf, kt, ci) to match the im2col row order above
    w_rw = jnp.transpose(params["w_rewrite"], (0, 2, 3, 1)).reshape(
        2 * chin, Kc).astype(jnp.bfloat16)
    b_rw = params["b_rewrite"].reshape(2 * chin, 1).astype(jnp.float32)
    g1 = params["g1"].reshape(2 * chin, 1).astype(jnp.float32)
    b1 = params["b1"].reshape(2 * chin, 1).astype(jnp.float32)
    w_tr = jnp.transpose(params["w_convtr"][:, :, :, 0], (2, 1, 0))   # (K, chout, chin)
    wab = w_tr.reshape(K * chout, chin).astype(jnp.bfloat16)          # stacked A|B taps
    b_tr = jnp.tile(params["b_convtr"], S).reshape(SC, 1).astype(jnp.float32)
    g2 = jnp.tile(params["g2"], S).reshape(SC, 1).astype(jnp.float32)
    b2 = jnp.tile(params["b2"], S).reshape(SC, 1).astype(jnp.float32)

    kern = functools.partial(_hdec_kernel, chin=chin, chout=chout, Fq=Fq, T=T,
                             Tl=Tl, S=S, last=last)

    # ---- VMEM budget: double-buffered blocks + weights + live slabs ---------
    blk_in = Kc * N * 2
    blk_out = SC * Lz * 2
    wbytes = (2 * chin * Kc + 2 * SC * chin) * 2 + (6 * chin + 3 * SC) * 4
    tmp = (2 * (2 * chin) * N) * 4 + chin * N * 2 + (2 * SC) * N * 4 \
        + 2 * SC * Lz * 4 + Lz * 4
    est = 2 * (blk_in + blk_out + wbytes) + tmp
    try:
        phys = getattr(pltpu.get_tpu_info(), "vmem_capacity_bytes", 128 << 20)
    except Exception:  # pragma: no cover - conservative fallback
        phys = 128 << 20
    vmem_limit = int(min((phys * 7) // 8, max(32 << 20, 2 * est)))

    flops = 2 * B * N * (2 * chin * Kc + 2 * SC * chin)
    cost = pl.CostEstimate(
        flops=int(flops),
        transcendentals=int(B * (chin * N + SC * Lz)),
        bytes_accessed=int(B * (blk_in + blk_out) + wbytes))

    grid_spec = pltpu.PrefetchScalarGridSpec(
        num_scalar_prefetch=0,
        grid=(B,),
        in_specs=[
            pl.BlockSpec((1, Kc, N), lambda b: (b, 0, 0)),
            pl.BlockSpec((2 * chin, Kc), lambda b: (0, 0)),
            pl.BlockSpec((2 * chin, 1), lambda b: (0, 0)),
            pl.BlockSpec((2 * chin, 1), lambda b: (0, 0)),
            pl.BlockSpec((2 * chin, 1), lambda b: (0, 0)),
            pl.BlockSpec((2 * SC, chin), lambda b: (0, 0)),
            pl.BlockSpec((SC, 1), lambda b: (0, 0)),
            pl.BlockSpec((SC, 1), lambda b: (0, 0)),
            pl.BlockSpec((SC, 1), lambda b: (0, 0)),
        ],
        out_specs=pl.BlockSpec((1, SC, Lz), lambda b: (b, 0, 0)),
    )

    raw = pl.pallas_call(
        kern,
        out_shape=jax.ShapeDtypeStruct((B, SC, Lz), jnp.bfloat16),
        grid_spec=grid_spec,
        compiler_params=pltpu.CompilerParams(
            dimension_semantics=("parallel",),
            vmem_limit_bytes=vmem_limit),
        cost_estimate=cost,
    )(xcol, w_rw, b_rw, g1, b1, wab, b_tr, g2, b2)

    # ---- glue: de-interleave polyphase groups, drop lane padding, crop freq --
    zg = raw.reshape(B, S, chout, Fq + 1, Tl)
    z = jnp.transpose(zg, (0, 2, 3, 1, 4)).reshape(B, chout, Fo, Tl)
    z = z[:, :, pad:Fo - pad, :T]
    assert z.shape == (B, chout, Fout, T)
    return z.astype(x.dtype)


def init_params(key, chin, chout, kernel_size=8, context=1):
    """Deterministic synthetic parameters matching HDecLayer's shapes."""
    ctaps = 1 + 2 * context
    k1, k2, k3, k4 = jax.random.split(key, 4)
    b_rw = 1.0 / np.sqrt(chin * ctaps * ctaps)
    b_tr = 1.0 / np.sqrt(chout * kernel_size)
    return dict(
        # rewrite = Conv2d(chin, 2*chin, 3, 1, 1): weight (2chin, chin, 3, 3)
        w_rewrite=jax.random.uniform(k1, (2 * chin, chin, ctaps, ctaps),
                                     jnp.float32, -b_rw, b_rw),
        b_rewrite=jax.random.uniform(k2, (2 * chin,), jnp.float32, -b_rw, b_rw),
        # norm1 = GroupNorm(1, 2*chin)
        g1=jnp.ones((2 * chin,), jnp.float32),
        b1=jnp.zeros((2 * chin,), jnp.float32),
        # conv_tr = ConvTranspose2d(chin, chout, (8,1), (4,1)): weight (chin, chout, 8, 1)
        w_convtr=jax.random.uniform(k3, (chin, chout, kernel_size, 1),
                                    jnp.float32, -b_tr, b_tr),
        b_convtr=jax.random.uniform(k4, (chout,), jnp.float32, -b_tr, b_tr),
        # norm2 = GroupNorm(1, chout)
        g2=jnp.ones((chout,), jnp.float32),
        b2=jnp.zeros((chout,), jnp.float32),
    )


if __name__ == "__main__":
    B, Fq, T = 2, 8, 16
    chin, chout = 8, 4            # decoder input x and encoder skip carry chin//2 each

    key = jax.random.PRNGKey(0)
    kx, ks, kp = jax.random.split(key, 3)
    x = jax.random.normal(kx, (B, chin // 2, Fq, T), jnp.float32)
    skip = jax.random.normal(ks, (B, chin // 2, Fq, T), jnp.float32)
    params = init_params(kp, chin, chout)

    out = hdec_layer_forward(x, skip, length=None, params=params,
                             chin=chin, chout=chout)
    out = jax.block_until_ready(out)
    assert out.shape == (B, chout, 4 * Fq, T), out.shape
    assert bool(jnp.all(jnp.isfinite(out)))
    print("KERNEL_OK")
</pallas_src>

<mosaic_0001>
module attributes {stable_mosaic.version = 11 : i64} {
  func.func @_hdec_kernel(%arg0: i32, %arg1: memref<1x72x1024xbf16, #tpu.memory_space<vmem>>, %arg2: memref<16x72xbf16, #tpu.memory_space<vmem>>, %arg3: memref<16x1xf32, #tpu.memory_space<vmem>>, %arg4: memref<16x1xf32, #tpu.memory_space<vmem>>, %arg5: memref<16x1xf32, #tpu.memory_space<vmem>>, %arg6: memref<32x8xbf16, #tpu.memory_space<vmem>>, %arg7: memref<16x1xf32, #tpu.memory_space<vmem>>, %arg8: memref<16x1xf32, #tpu.memory_space<vmem>>, %arg9: memref<16x1xf32, #tpu.memory_space<vmem>>, %arg10: memref<1x16x1152xbf16, #tpu.memory_space<vmem>>) attributes {dimension_semantics = [#tpu.dimension_semantics<parallel>], iteration_bounds = array<i64: 2>, scalar_prefetch = 0 : i64, scratch_operands = 0 : i64, tpu.core_type = #tpu.core_type<tc>, window_params = [{transform_indices = @transform_0, window_bounds = array<i64: 1, 72, 1024>}, {pipeline_mode = #tpu.pipeline_mode<synchronous>, transform_indices = @transform_1, window_bounds = array<i64: 16, 72>}, {pipeline_mode = #tpu.pipeline_mode<synchronous>, transform_indices = @transform_2, window_bounds = array<i64: 16, 1>}, {pipeline_mode = #tpu.pipeline_mode<synchronous>, transform_indices = @transform_3, window_bounds = array<i64: 16, 1>}, {pipeline_mode = #tpu.pipeline_mode<synchronous>, transform_indices = @transform_4, window_bounds = array<i64: 16, 1>}, {pipeline_mode = #tpu.pipeline_mode<synchronous>, transform_indices = @transform_5, window_bounds = array<i64: 32, 8>}, {pipeline_mode = #tpu.pipeline_mode<synchronous>, transform_indices = @transform_6, window_bounds = array<i64: 16, 1>}, {pipeline_mode = #tpu.pipeline_mode<synchronous>, transform_indices = @transform_7, window_bounds = array<i64: 16, 1>}, {pipeline_mode = #tpu.pipeline_mode<synchronous>, transform_indices = @transform_8, window_bounds = array<i64: 16, 1>}, {transform_indices = @transform_9, window_bounds = array<i64: 1, 16, 1152>}]} {
    %0 = tpu.iota {dimensions = array<i32: 1>} : vector<1x1152xi32>
    %c128_i32 = arith.constant 128 : i32
    %c0_i32 = arith.constant 0 : i32
    %1 = arith.cmpi eq, %c128_i32, %c0_i32 : i32
    %c1_i32 = arith.constant 1 : i32
    %2 = arith.select %1, %c1_i32, %c128_i32 : i32
    %3 = vector.broadcast %2 : i32 to vector<1x1152xi32>
    %4 = arith.remsi %0, %3 : vector<1x1152xi32>
    %c0_i32_0 = arith.constant 0 : i32
    %5 = vector.broadcast %c0_i32_0 : i32 to vector<1x1152xi32>
    %6 = arith.cmpi ne, %4, %5 : vector<1x1152xi32>
    %c0_i32_1 = arith.constant 0 : i32
    %7 = vector.broadcast %c0_i32_1 : i32 to vector<1x1152xi32>
    %8 = arith.cmpi slt, %4, %7 : vector<1x1152xi32>
    %c0_i32_2 = arith.constant 0 : i32
    %9 = arith.cmpi slt, %2, %c0_i32_2 : i32
    %10 = vector.broadcast %9 : i1 to vector<1x1152xi1>
    %11 = vector.broadcast %10 : vector<1x1152xi1> to vector<1x1152xi1>
    %12 = arith.xori %8, %11 : vector<1x1152xi1>
    %13 = arith.andi %12, %6 : vector<1x1152xi1>
    %14 = vector.broadcast %2 : i32 to vector<1x1152xi32>
    %15 = arith.addi %4, %14 : vector<1x1152xi32>
    %16 = arith.select %13, %15, %4 : vector<1x1152xi1>, vector<1x1152xi32>
    %c16_i32 = arith.constant 16 : i32
    %17 = vector.broadcast %c16_i32 : i32 to vector<1x1152xi32>
    %18 = arith.cmpi slt, %16, %17 : vector<1x1152xi32>
    %19 = arith.extui %18 : vector<1x1152xi1> to vector<1x1152xi32>
    %20 = arith.sitofp %19 : vector<1x1152xi32> to vector<1x1152xf32>
    %21 = vector.extract_strided_slice %20 {offsets = [0, 0], sizes = [1, 1024], strides = [1, 1]} : vector<1x1152xf32> to vector<1x1024xf32>
    %c0 = arith.constant 0 : index
    %c0_3 = arith.constant 0 : index
    %22 = vector.load %arg2[%c0, %c0_3] : memref<16x72xbf16, #tpu.memory_space<vmem>>, vector<16x72xbf16>
    %c0_4 = arith.constant 0 : index
    %c0_5 = arith.constant 0 : index
    %c0_6 = arith.constant 0 : index
    %23 = vector.load %arg1[%c0_4, %c0_5, %c0_6] : memref<1x72x1024xbf16, #tpu.memory_space<vmem>>, vector<1x72x1024xbf16>
    %24 = vector.shape_cast %23 : vector<1x72x1024xbf16> to vector<72x1024xbf16>
    %cst = arith.constant dense<0.000000e+00> : vector<16x1024xf32>
    %25 = tpu.matmul %22, %24, %cst {dimension_numbers = #tpu.dot_dimension_numbers<[1], [0], [0], [1], [0, 0, 1, 1], [], []>} : vector<16x72xbf16>, vector<72x1024xbf16>, vector<16x1024xf32> -> vector<16x1024xf32>
    %c0_7 = arith.constant 0 : index
    %c0_8 = arith.constant 0 : index
    %26 = vector.load %arg3[%c0_7, %c0_8] : memref<16x1xf32, #tpu.memory_space<vmem>>, vector<16x1xf32>
    %27 = vector.broadcast %26 : vector<16x1xf32> to vector<16x1024xf32>
    %28 = arith.addf %25, %27 : vector<16x1024xf32>
    %29 = vector.broadcast %21 : vector<1x1024xf32> to vector<16x1024xf32>
    %30 = arith.mulf %28, %29 : vector<16x1024xf32>
    %cst_9 = arith.constant dense<0.000000e+00> : vector<16xf32>
    %31 = vector.multi_reduction <add>, %30, %cst_9 [1] : vector<16x1024xf32> to vector<16xf32>
    %32 = vector.shape_cast %31 : vector<16xf32> to vector<16x1xf32>
    %33 = arith.mulf %30, %30 : vector<16x1024xf32>
    %cst_10 = arith.constant dense<0.000000e+00> : vector<16xf32>
    %34 = vector.multi_reduction <add>, %33, %cst_10 [1] : vector<16x1024xf32> to vector<16xf32>
    %35 = vector.shape_cast %34 : vector<16xf32> to vector<16x1xf32>
    %36 = vector.shape_cast %32 : vector<16x1xf32> to vector<1x16x1xf32>
    %cst_11 = arith.constant dense<0.000000e+00> : vector<1xf32>
    %37 = vector.multi_reduction <add>, %36, %cst_11 [1, 2] : vector<1x16x1xf32> to vector<1xf32>
    %38 = vector.shape_cast %37 : vector<1xf32> to vector<1x1x1xf32>
    %39 = vector.extract %38[0, 0, 0] : f32 from vector<1x1x1xf32>
    %cst_12 = arith.constant 2.048000e+03 : f32
    %40 = arith.divf %39, %cst_12 : f32
    %41 = vector.shape_cast %35 : vector<16x1xf32> to vector<1x16x1xf32>
    %cst_13 = arith.constant dense<0.000000e+00> : vector<1xf32>
    %42 = vector.multi_reduction <add>, %41, %cst_13 [1, 2] : vector<1x16x1xf32> to vector<1xf32>
    %43 = vector.shape_cast %42 : vector<1xf32> to vector<1x1x1xf32>
    %44 = vector.extract %43[0, 0, 0] : f32 from vector<1x1x1xf32>
    %cst_14 = arith.constant 2.048000e+03 : f32
    %45 = arith.divf %44, %cst_14 : f32
    %46 = arith.mulf %40, %40 : f32
    %47 = arith.subf %45, %46 : f32
    %cst_15 = arith.constant 0.000000e+00 : f32
    %48 = arith.maximumf %47, %cst_15 : f32
    %c0_16 = arith.constant 0 : index
    %c0_17 = arith.constant 0 : index
    %49 = vector.load %arg4[%c0_16, %c0_17] : memref<16x1xf32, #tpu.memory_space<vmem>>, vector<16x1xf32>
    %cst_18 = arith.constant 9.99999974E-6 : f32
    %50 = arith.addf %48, %cst_18 : f32
    %51 = math.rsqrt %50 : f32
    %52 = vector.broadcast %51 : f32 to vector<16x1xf32>
    %53 = arith.mulf %49, %52 : vector<16x1xf32>
    %c0_19 = arith.constant 0 : index
    %c0_20 = arith.constant 0 : index
    %54 = vector.load %arg5[%c0_19, %c0_20] : memref<16x1xf32, #tpu.memory_space<vmem>>, vector<16x1xf32>
    %55 = vector.broadcast %40 : f32 to vector<16x1xf32>
    %56 = arith.mulf %55, %53 : vector<16x1xf32>
    %57 = arith.subf %54, %56 : vector<16x1xf32>
    %58 = vector.broadcast %53 : vector<16x1xf32> to vector<16x1024xf32>
    %59 = arith.mulf %28, %58 : vector<16x1024xf32>
    %60 = vector.broadcast %57 : vector<16x1xf32> to vector<16x1024xf32>
    %61 = arith.addf %59, %60 : vector<16x1024xf32>
    %62 = vector.extract_strided_slice %61 {offsets = [0, 0], sizes = [8, 1024], strides = [1, 1]} : vector<16x1024xf32> to vector<8x1024xf32>
    %63 = vector.extract_strided_slice %61 {offsets = [8, 0], sizes = [8, 1024], strides = [1, 1]} : vector<16x1024xf32> to vector<8x1024xf32>
    %64 = arith.negf %63 : vector<8x1024xf32>
    %65 = math.exp %64 : vector<8x1024xf32>
    %cst_21 = arith.constant 1.000000e+00 : f32
    %66 = vector.broadcast %cst_21 : f32 to vector<8x1024xf32>
    %67 = arith.addf %66, %65 : vector<8x1024xf32>
    %68 = arith.divf %66, %67 : vector<8x1024xf32>
    %69 = arith.mulf %62, %68 : vector<8x1024xf32>
    %70 = arith.truncf %69 : vector<8x1024xf32> to vector<8x1024xbf16>
    %c0_22 = arith.constant 0 : index
    %c0_23 = arith.constant 0 : index
    %71 = vector.load %arg6[%c0_22, %c0_23] : memref<32x8xbf16, #tpu.memory_space<vmem>>, vector<32x8xbf16>
    %cst_24 = arith.constant dense<0.000000e+00> : vector<32x1024xf32>
    %72 = tpu.matmul %71, %70, %cst_24 {dimension_numbers = #tpu.dot_dimension_numbers<[1], [0], [0], [1], [0, 0, 1, 1], [], []>} : vector<32x8xbf16>, vector<8x1024xbf16>, vector<32x1024xf32> -> vector<32x1024xf32>
    %73 = vector.extract_strided_slice %72 {offsets = [0, 0], sizes = [16, 128], strides = [1, 1]} : vector<32x1024xf32> to vector<16x128xf32>
    %74 = vector.extract_strided_slice %72 {offsets = [0, 128], sizes = [16, 896], strides = [1, 1]} : vector<32x1024xf32> to vector<16x896xf32>
    %75 = vector.extract_strided_slice %72 {offsets = [16, 0], sizes = [16, 896], strides = [1, 1]} : vector<32x1024xf32> to vector<16x896xf32>
    %76 = arith.addf %74, %75 : vector<16x896xf32>
    %77 = vector.extract_strided_slice %72 {offsets = [16, 896], sizes = [16, 128], strides = [1, 1]} : vector<32x1024xf32> to vector<16x128xf32>
    %78 = tpu.concatenate %73, %76, %77 in 1 : vector<16x128xf32>, vector<16x896xf32>, vector<16x128xf32> -> vector<16x1152xf32>
    %c0_25 = arith.constant 0 : index
    %c0_26 = arith.constant 0 : index
    %79 = vector.load %arg7[%c0_25, %c0_26] : memref<16x1xf32, #tpu.memory_space<vmem>>, vector<16x1xf32>
    %80 = vector.broadcast %79 : vector<16x1xf32> to vector<16x1152xf32>
    %81 = arith.addf %78, %80 : vector<16x1152xf32>
    %82 = vector.broadcast %20 : vector<1x1152xf32> to vector<16x1152xf32>
    %83 = arith.mulf %81, %82 : vector<16x1152xf32>
    %cst_27 = arith.constant dense<0.000000e+00> : vector<16xf32>
    %84 = vector.multi_reduction <add>, %83, %cst_27 [1] : vector<16x1152xf32> to vector<16xf32>
    %85 = vector.shape_cast %84 : vector<16xf32> to vector<16x1xf32>
    %86 = arith.mulf %83, %83 : vector<16x1152xf32>
    %cst_28 = arith.constant dense<0.000000e+00> : vector<16xf32>
    %87 = vector.multi_reduction <add>, %86, %cst_28 [1] : vector<16x1152xf32> to vector<16xf32>
    %88 = vector.shape_cast %87 : vector<16xf32> to vector<16x1xf32>
    %89 = vector.shape_cast %85 : vector<16x1xf32> to vector<1x16x1xf32>
    %cst_29 = arith.constant dense<0.000000e+00> : vector<1xf32>
    %90 = vector.multi_reduction <add>, %89, %cst_29 [1, 2] : vector<1x16x1xf32> to vector<1xf32>
    %91 = vector.shape_cast %90 : vector<1xf32> to vector<1x1x1xf32>
    %92 = vector.extract %91[0, 0, 0] : f32 from vector<1x1x1xf32>
    %cst_30 = arith.constant 2.304000e+03 : f32
    %93 = arith.divf %92, %cst_30 : f32
    %94 = vector.shape_cast %88 : vector<16x1xf32> to vector<1x16x1xf32>
    %cst_31 = arith.constant dense<0.000000e+00> : vector<1xf32>
    %95 = vector.multi_reduction <add>, %94, %cst_31 [1, 2] : vector<1x16x1xf32> to vector<1xf32>
    %96 = vector.shape_cast %95 : vector<1xf32> to vector<1x1x1xf32>
    %97 = vector.extract %96[0, 0, 0] : f32 from vector<1x1x1xf32>
    %cst_32 = arith.constant 2.304000e+03 : f32
    %98 = arith.divf %97, %cst_32 : f32
    %99 = arith.mulf %93, %93 : f32
    %100 = arith.subf %98, %99 : f32
    %cst_33 = arith.constant 0.000000e+00 : f32
    %101 = arith.maximumf %100, %cst_33 : f32
    %c0_34 = arith.constant 0 : index
    %c0_35 = arith.constant 0 : index
    %102 = vector.load %arg8[%c0_34, %c0_35] : memref<16x1xf32, #tpu.memory_space<vmem>>, vector<16x1xf32>
    %cst_36 = arith.constant 9.99999974E-6 : f32
    %103 = arith.addf %101, %cst_36 : f32
    %104 = math.rsqrt %103 : f32
    %105 = vector.broadcast %104 : f32 to vector<16x1xf32>
    %106 = arith.mulf %102, %105 : vector<16x1xf32>
    %c0_37 = arith.constant 0 : index
    %c0_38 = arith.constant 0 : index
    %107 = vector.load %arg9[%c0_37, %c0_38] : memref<16x1xf32, #tpu.memory_space<vmem>>, vector<16x1xf32>
    %108 = vector.broadcast %93 : f32 to vector<16x1xf32>
    %109 = arith.mulf %108, %106 : vector<16x1xf32>
    %110 = arith.subf %107, %109 : vector<16x1xf32>
    %111 = vector.broadcast %106 : vector<16x1xf32> to vector<16x1152xf32>
    %112 = arith.mulf %81, %111 : vector<16x1152xf32>
    %113 = vector.broadcast %110 : vector<16x1xf32> to vector<16x1152xf32>
    %114 = arith.addf %112, %113 : vector<16x1152xf32>
    %cst_39 = arith.constant 5.000000e-01 : f32
    %115 = vector.broadcast %cst_39 : f32 to vector<16x1152xf32>
    %116 = arith.mulf %115, %114 : vector<16x1152xf32>
    %cst_40 = arith.constant 0.707106769 : f32
    %117 = vector.broadcast %cst_40 : f32 to vector<16x1152xf32>
    %118 = arith.mulf %114, %117 : vector<16x1152xf32>
    %119 = math.erf %118 : vector<16x1152xf32>
    %cst_41 = arith.constant 1.000000e+00 : f32
    %120 = vector.broadcast %cst_41 : f32 to vector<16x1152xf32>
    %121 = arith.addf %120, %119 : vector<16x1152xf32>
    %122 = arith.mulf %116, %121 : vector<16x1152xf32>
    %123 = arith.truncf %122 : vector<16x1152xf32> to vector<16x1152xbf16>
    %c0_42 = arith.constant 0 : index
    %c0_43 = arith.constant 0 : index
    %c0_44 = arith.constant 0 : index
    %124 = vector.load %arg10[%c0_42, %c0_43, %c0_44] : memref<1x16x1152xbf16, #tpu.memory_space<vmem>>, vector<1x16x1152xbf16>
    %125 = vector.shape_cast %124 : vector<1x16x1152xbf16> to vector<16x1152xbf16>
    %126 = vector.shape_cast %123 : vector<16x1152xbf16> to vector<1x16x1152xbf16>
    tpu.vector_store %arg10[%c0_42, %c0_43, %c0_44], %126 {strides = array<i32>} : memref<1x16x1152xbf16, #tpu.memory_space<vmem>>, vector<1x16x1152xbf16>,
    return
  }
  func.func @transform_0(%arg0: i32) -> (i32, i32, i32) {
    %c0_i32 = arith.constant 0 : i32
    %c0_i32_0 = arith.constant 0 : i32
    %c0_i32_1 = arith.constant 0 : i32
    return %arg0, %c0_i32, %c0_i32_0 : i32, i32, i32
  }
  func.func @transform_1(%arg0: i32) -> (i32, i32) {
    %c0_i32 = arith.constant 0 : i32
    %c0_i32_0 = arith.constant 0 : i32
    %c0_i32_1 = arith.constant 0 : i32
    return %c0_i32, %c0_i32_0 : i32, i32
  }
  func.func @transform_2(%arg0: i32) -> (i32, i32) {
    %c0_i32 = arith.constant 0 : i32
    %c0_i32_0 = arith.constant 0 : i32
    %c0_i32_1 = arith.constant 0 : i32
    return %c0_i32, %c0_i32_0 : i32, i32
  }
  func.func @transform_3(%arg0: i32) -> (i32, i32) {
    %c0_i32 = arith.constant 0 : i32
    %c0_i32_0 = arith.constant 0 : i32
    %c0_i32_1 = arith.constant 0 : i32
    return %c0_i32, %c0_i32_0 : i32, i32
  }
  func.func @transform_4(%arg0: i32) -> (i32, i32) {
    %c0_i32 = arith.constant 0 : i32
    %c0_i32_0 = arith.constant 0 : i32
    %c0_i32_1 = arith.constant 0 : i32
    return %c0_i32, %c0_i32_0 : i32, i32
  }
  func.func @transform_5(%arg0: i32) -> (i32, i32) {
    %c0_i32 = arith.constant 0 : i32
    %c0_i32_0 = arith.constant 0 : i32
    %c0_i32_1 = arith.constant 0 : i32
    return %c0_i32, %c0_i32_0 : i32, i32
  }
  func.func @transform_6(%arg0: i32) -> (i32, i32) {
    %c0_i32 = arith.constant 0 : i32
    %c0_i32_0 = arith.constant 0 : i32
    %c0_i32_1 = arith.constant 0 : i32
    return %c0_i32, %c0_i32_0 : i32, i32
  }
  func.func @transform_7(%arg0: i32) -> (i32, i32) {
    %c0_i32 = arith.constant 0 : i32
    %c0_i32_0 = arith.constant 0 : i32
    %c0_i32_1 = arith.constant 0 : i32
    return %c0_i32, %c0_i32_0 : i32, i32
  }
  func.func @transform_8(%arg0: i32) -> (i32, i32) {
    %c0_i32 = arith.constant 0 : i32
    %c0_i32_0 = arith.constant 0 : i32
    %c0_i32_1 = arith.constant 0 : i32
    return %c0_i32, %c0_i32_0 : i32, i32
  }
  func.func @transform_9(%arg0: i32) -> (i32, i32, i32) {
    %c0_i32 = arith.constant 0 : i32
    %c0_i32_0 = arith.constant 0 : i32
    %c0_i32_1 = arith.constant 0 : i32
    return %arg0, %c0_i32, %c0_i32_0 : i32, i32, i32
  }
}

</mosaic_0001>

<bundles_post_ra>
// kernel: tpu_custom_call.1
= control target key start
LH: loop header
LB: loop body
LE: loop exit
PB: predicated region body
PF: predicated region fallthrough
CT: control target
= control target key end

     0   :  { %14 = vsyncpa [#allocation3], 0  ;;  %s4688_s0 = inlined_call_operand.hbm [shape: bf16[2,72,1024], index: 0, kind: input, shape index: {}]   ;;  %s4689_s1 = inlined_call_operand.vmem [shape: bf16[16,72], index: 1, kind: input, shape index: {}]   ;;  %s4690_s2 = inlined_call_operand.vmem [shape: f32[16,1], index: 2, kind: input, shape index: {}]   ;;  %s4691_s3 = inlined_call_operand.vmem [shape: f32[16,1], index: 3, kind: input, shape index: {}]   ;;  %s4692_s4 = inlined_call_operand.vmem [shape: f32[16,1], index: 4, kind: input, shape index: {}]   ;;  %s4693_s5 = inlined_call_operand.vmem [shape: bf16[32,8], index: 5, kind: input, shape index: {}]   ;;  %s4694_s6 = inlined_call_operand.vmem [shape: f32[16,1], index: 6, kind: input, shape index: {}]   ;;  %s4695_s7 = inlined_call_operand.vmem [shape: f32[16,1], index: 7, kind: input, shape index: {}]   ;;  %s4696_s8 = inlined_call_operand.vmem [shape: f32[16,1], index: 8, kind: input, shape index: {}]   ;;  %s4697_s9 = inlined_call_operand.hbm [shape: bf16[2,16,1152], index: 9, kind: output, shape index: {}]  }
   0x1   :  { %16 = vsyncpa [#allocation3 + $0x1], 0 }
   0x2   :  { %17 = vsyncpa [#allocation4], 0 }
   0x3   :  { %19 = vsyncpa [#allocation4 + $0x1], 0  ;;  %s3132_s30 = smov 0   ;;  %s3134_s10 = smov 0  }
   0x4   :  { %s3136_s11 = smov 0   ;;  %s3138_s12 = smov 0  }
   0x5 LB: > { %4704 = sst [smem:[#allocation8_spill]] %s3067_s11  ;;  %s3153_s13 = sadd.s32 4294967295, %s3071_s12   ;;  %s3071_s12 = sphi %s3138_s12, %s4777_s12   ;;  %s3067_s11 = sphi %s3136_s11, %s4779_s11   ;;  %s3063_s10 = sphi %s3134_s10, %s4781_s10   ;;  %s3059_s30 = sphi %s3132_s30, %s4780_s30  }
   0x6   : > { %s2578_s14 = sadd.s32 4294967294, %s3071_s12   ;;  %s3157_s15 = sadd.s32 1, %s3071_s12  }
   0x7   : > { %4705 = sst [smem:[#allocation9_spill]] %s3157_s15  ;;  %s32_s16 = sadd.s32 1, %s3067_s11 }
   0x8   : > { %s29_s17 = ssub.s32 %s3071_s12, %s3157_s15  ;;  %p39_p0 = scmp.ne.s32.totalorder %s3067_s11, %s3063_s10 }
   0x9   : > { %p30_p1 = scmp.eq.s32.totalorder %s29_s17, 0  ;;  %p40_p2 = scmp.eq.s32.totalorder %s3071_s12, 0 }
   0xa   : > { %p45_p3 = scmp.ne.s32.totalorder %s3063_s10, %s3059_s30  ;;  %p46_p4 = scmp.eq.s32.totalorder %s3153_s13, 0 }
   0xb   : > { %s3169_s18 = scalar_select %p30_p1, %s3067_s11, %s32_s16  }
   0xc   : > { %p41_p5 = por %p40_p2, %p39_p0  ;;  %p3171_p6 = por %p46_p4, %p45_p3 }
   0xd   : > { %4706 = sst [smem:[#allocation10_spill]] %s3169_s18  ;;  %p237_p7 = scmp.eq.s32.totalorder %s3153_s13, 1 }
   0xe   : > { %p243_p8 = scmp.eq.s32.totalorder %s2578_s14, 1  ;;  %p2580_p9 = scmp.ge.s32.totalorder %s3071_s12, 2 }
   0xf   : > { %p2853_p10 = scmp.lt.s32.totalorder %s3071_s12, 2  ;;  %p3178_p11 = por %p237_p7, %p39_p0 }
  0x10   : > { %p3182_p12 = por %p243_p8, %p45_p3  ;;  %s287_s22 = sand.u32 1, %s3067_s11  }
  0x11   : > { %s2821_s23 = smul.u32 288, %s3071_s12  ;;  %p3191_p13 = pnand %p2853_p10, %p41_p5 }
  0x12   : > { %s4709_s21 = scalar_select %p3182_p12, 1, 0 }
  0x13   : > { %s2820_s24 = smul.u32 288, %s287_s22  ;;  %s296_s27 = scalar_lea.hbm %s4688_s0, %s2821_s23 }
  0x14   : > { %4710 = sst [smem:[#allocation11_spill]] %s4709_s21  ;;  %s297_s29 = sshll.u32 %s296_s27, 4  ;;  %s298_s29 = int_to_ptr.hbm [resolvable:$true] %s297_s29 }
  0x15   : > { %s291_s14 = scalar_lea.vmem [#allocation2], %s2820_s24  ;;  %s288_s17 = scalar_lea.sflag [#allocation3], %s287_s22 }
  0x16   : > { %s299_s16 = sshll.u32 %s291_s14, 4  ;;  %s2975_s18 = sshra.s32 %s298_s29, 4  ;;  %s300_s16 = int_to_ptr.vmem [resolvable:$true] %s299_s16  ;;  %s2976_s18 = int_to_ptr.hbm [resolvable:$true] %s2975_s18 }
  0x17   : > { %s2977_s11 = scalar_lea.hbm %s2976_s18, 288  ;;  %p2979_p1 = pneg %p3191_p13 }
  0x18   : > { %p2978_p0 = scmp.ne.s32.totalorder %s2976_s18, %s2977_s11  ;;  %s2982_s26 = scalar_lea.hbm %s4688_s0, 576 }
  0x19   : > { %p2983_p4 = scmp.lt.s32.totalorder %s2976_s18, %s4688_s0  ;;  %p2984_p5 = scmp.lt.s32.totalorder %s2982_s26, %s2977_s11 }
  0x1a   : > { %p2980_p2 = pnand %p2979_p1, %p2978_p0 }
  0x1b   : > { %p2985_p7 = por %p2984_p5, %p2983_p4 }
  0x1c   : > { %p2981_p3 = pneg %p2980_p2 }
  0x1e   : > { %p2986_p8 = pnand %p2985_p7, %p2981_p3 }
  0x20   : > { %2989 = shalt.err (!%p2986_p8)
}
  0x21   : > { %s3073_s22 = smov 512   ;;  %s3074_s24 = smov 32  }
  0x22   : > { %2848 = dma.hbm_to_vmem [thread:$0]  (!%p3191_p13), %s298_s29, 4608, %s300_s16, %s288_s17, %s3073_s22, %s3073_s22, %s3074_s24  }
  0x23   : > { %p2582_p10 = scmp.ge.s32.totalorder %s3071_s12, 1  ;;  %p307_p0 = scmp.lt.s32.totalorder %s3071_s12, 3 }
  0x25   : > { %p308_p1 = pnand %p2582_p10, %p307_p0 }
  0x26   : > { %s3208_s27 = sand.u32 (!%p308_p1), 1, %s3063_s10  }
  0x27   : > { %311 = sbr.rel (%p308_p1) target bundleno = 1702 (0x6a6), region = 56  ;;  %s314_s15 = scalar_lea.sflag (!%p308_p1), [#allocation3], %s3208_s27 }
  0x28   : > { %s2822_s11 = smul.u32 (!%p308_p1), 288, %s3208_s27 }
  0x2a   : > { %s3212_s18 = scalar_lea.vmem (!%p308_p1), [#allocation2], %s2822_s11 }
  0x2c   : > { %3050 = dma.done.wait (%p3171_p6), %s314_s15, 4608  }
  0x2d   : > { %3052 = vsyncadd (%p3171_p6), %s314_s15, 4294962688  ;;  %v533_v0 = vld [vmem:[%s3212_s18 + $0x100] sm:$0xff]  ;;  %v534_v1 = vld [vmem:[%s3212_s18 + $0x108] sm:$0xff]  ;;  %vm4703_vm0 = vcmask 1043456   ;;  %v3075_v50 = vmov 0   ;;  %vm734_vm1 = vcmask 588800  }
  0x2e   : > { %v654_v2 = vunpack.c.l.b16 %v533_v0  ;;  %v655_v3 = vunpack.c.h.b16 %v533_v0  ;;  %v656_v4 = vunpack.c.l.b16 %v534_v1  ;;  %v657_v5 = vunpack.c.h.b16 %v534_v1  ;;  %v2694_v6 = vld [vmem:[%s3212_s18 + $0xc0] sm:$0xf]  ;;  %v2810_v12 = vld [vmem:[%s3212_s18 + $0xc4] sm:$0xf]  ;;  %v2702_v14 = vld [vmem:[%s3212_s18 + $0xc8] sm:$0xf]  ;;  %2896 = vset.pattern.permute.xlu0 %v3075_v50  ;;  %2897 = vset.pattern.permute.xlu2 %v3075_v50 }
  0x2f   : > { %v2814_v7 = vld [vmem:[%s3212_s18 + $0xdc] sm:$0xf0]  ;;  %v2696_v13 = vld [vmem:[%s3212_s18 + $0xe0] sm:$0xf0]  ;;  %v2815_v15 = vld [vmem:[%s3212_s18 + $0xe4] sm:$0xf0]  ;;  %2898 = vset.pattern.permute.xlu1 %v3075_v50 }
  0x30   : > { %v694_v8 = vpack.c.b16 %v654_v2, %v654_v2  ;;  %v695_v9 = vpack.c.b16 %v655_v3, %v655_v3  ;;  %v696_v10 = vpack.c.b16 %v656_v4, %v656_v4  ;;  %v697_v11 = vpack.c.b16 %v657_v5, %v657_v5  ;;  %v2811_v16 = vld [vmem:[%s3212_s18 + $0xcc] sm:$0xf]  ;;  %v2662_v24 = vld [vmem:[%s3212_s18 + $0x80] sm:$0xf]  ;;  %v2802_v28 = vld [vmem:[%s3212_s18 + $0x84] sm:$0xf] }
  0x31   : > { %v2704_v17 = vld [vmem:[%s3212_s18 + $0xe8] sm:$0xf0]  ;;  %v2695_v22 = vor.u32 %v2814_v7, %v2694_v6  ;;  %v2699_v23 = vor.u32 %v2810_v12, %v2696_v13  ;;  %v2806_v25 = vld [vmem:[%s3212_s18 + $0x9c] sm:$0xf0]  ;;  %v2703_v26 = vor.u32 %v2815_v15, %v2702_v14  ;;  %v2664_v29 = vld [vmem:[%s3212_s18 + $0xa0] sm:$0xf0] }
  0x32   : > { %v740_v18 = vsel %vm4703_vm0, %v694_v8, 0  ;;  %v743_v19 = vsel %vm4703_vm0, %v695_v9, 0  ;;  %v746_v20 = vsel %vm4703_vm0, %v696_v10, 0  ;;  %v749_v21 = vsel %vm4703_vm0, %v697_v11, 0  ;;  %v2670_v30 = vld [vmem:[%s3212_s18 + $0x88] sm:$0xf] }
  0x33   : > { %766 = vmatpush.bf16.msra.mxu0 %v740_v18  ;;  %780 = vmatpush.bf16.msra.mxu1 %v743_v19  ;;  %v2707_v27 = vor.u32 %v2811_v16, %v2704_v17  ;;  %v2807_v31 = vld [vmem:[%s3212_s18 + $0xa4] sm:$0xf0]  ;;  %v2803_v32 = vld [vmem:[%s3212_s18 + $0x8c] sm:$0xf]  ;;  %v2630_v34 = vld [vmem:[%s3212_s18 + $0x40] sm:$0xf]  ;;  %v2663_v35 = vor.u32 %v2806_v25, %v2662_v24  ;;  %v2667_v36 = vor.u32 %v2802_v28, %v2664_v29 }
  0x34   : > { %794 = vmatpush.bf16.msra.mxu2 %v746_v20  ;;  %808 = vmatpush.bf16.msra.mxu3 %v749_v21  ;;  %v2672_v33 = vld [vmem:[%s3212_s18 + $0xa8] sm:$0xf0]  ;;  %v2798_v37 = vld [vmem:[%s3212_s18 + $0x5c] sm:$0xf0]  ;;  %v2794_v38 = vld [vmem:[%s3212_s18 + $0x44] sm:$0xf]  ;;  %v2671_v40 = vor.u32 %v2807_v31, %v2670_v30 }
  0x35   : > { %v2632_v39 = vld [vmem:[%s3212_s18 + $0x60] sm:$0xf0]  ;;  %v2675_v41 = vor.u32 %v2803_v32, %v2672_v33  ;;  %v2638_v42 = vld [vmem:[%s3212_s18 + $0x48] sm:$0xf]  ;;  %v2795_v44 = vld [vmem:[%s3212_s18 + $0x4c] sm:$0xf]  ;;  %v2631_v51 = vor.u32 %v2798_v37, %v2630_v34 }
  0x36   : > { %v2799_v43 = vld [vmem:[%s3212_s18 + $0x64] sm:$0xf0]  ;;  %v2640_v45 = vld [vmem:[%s3212_s18 + $0x68] sm:$0xf0]  ;;  %v535_v46 = vld [vmem:[%s3212_s18 + $0x110] sm:$0xff]  ;;  %v2635_v52 = vor.u32 %v2794_v38, %v2632_v39  ;;  %vm4702_vm10 = vcmask 7168  }
  0x37   : > { %767 = vmatpush.bf16.msra.mxu0 %v2695_v22  ;;  %781 = vmatpush.bf16.msra.mxu1 %v2699_v23  ;;  %v536_v47 = vld [vmem:[%s3212_s18 + $0x118] sm:$0xff]  ;;  %v658_v48 = vunpack.c.l.b16 %v535_v46  ;;  %v659_v49 = vunpack.c.h.b16 %v535_v46  ;;  %v2598_v53 = vld [vmem:[%s3212_s18] sm:$0xf]  ;;  %v2639_v57 = vor.u32 %v2799_v43, %v2638_v42  ;;  %v2643_v58 = vor.u32 %v2795_v44, %v2640_v45  ;;  %v2786_v59 = vld [vmem:[%s3212_s18 + $0x4] sm:$0xf]  ;;  %s3078_s15 = smov 0.0  }
  0x38   : > { %795 = vmatpush.bf16.msra.mxu2 %v2703_v26  ;;  %809 = vmatpush.bf16.msra.mxu3 %v2707_v27  ;;  %v2790_v54 = vld [vmem:[%s3212_s18 + $0x1c] sm:$0xf0]  ;;  %v660_v55 = vunpack.c.l.b16 %v536_v47  ;;  %v661_v56 = vunpack.c.h.b16 %v536_v47  ;;  %v2600_v60 = vld [vmem:[%s3212_s18 + $0x20] sm:$0xf0]  ;;  %v2606_v61 = vld [vmem:[%s3212_s18 + $0x8] sm:$0xf] }
  0x39   : > { %v2791_v62 = vld [vmem:[%s3212_s18 + $0x24] sm:$0xf0]  ;;  %v2787_v63 = vld [vmem:[%s3212_s18 + $0xc] sm:$0xf]  ;;  %v2599_v1 = vor.u32 %v2790_v54, %v2598_v53  ;;  %v698_v2 = vpack.c.b16 %v658_v48, %v658_v48  ;;  %v699_v3 = vpack.c.b16 %v659_v49, %v659_v49  ;;  %v537_v4 = vld [vmem:[%s4690_s2] sm:$0xff]  ;;  %v2603_v5 = vor.u32 %v2786_v59, %v2600_v60 }
  0x3a   : > { %v2608_v0 = vld [vmem:[%s3212_s18 + $0x28] sm:$0xf0]  ;;  %v700_v6 = vpack.c.b16 %v660_v55, %v660_v55  ;;  %v701_v7 = vpack.c.b16 %v661_v56, %v661_v56  ;;  %v2607_v8 = vor.u32 %v2791_v62, %v2606_v61  ;;  %v2710_v10 = vld [vmem:[%s3212_s18 + $0xd0] sm:$0xf]  ;;  %v3265_v11 = vld [vmem:[%s4689_s1] sm:$0xff]  ;;  %541 = vperm.xlu0 %2896, %v537_v4  }
  0x3b   : > { %768 = vmatpush.bf16.msra.mxu0 %v2663_v35  ;;  %782 = vmatpush.bf16.msra.mxu1 %v2667_v36  ;;  %v2611_v9 = vor.u32 %v2787_v63, %v2608_v0  ;;  %v2816_v12 = vld [vmem:[%s3212_s18 + $0xec] sm:$0xf0]  ;;  %v2812_v13 = vld [vmem:[%s3212_s18 + $0xd4] sm:$0xf]  ;;  %v752_v15 = vsel %vm4703_vm0, %v698_v2, 0  ;;  %v755_v16 = vsel %vm4703_vm0, %v699_v3, 0  ;;  %v354_v0 = vlaneseq }
  0x3c   : > { %796 = vmatpush.bf16.msra.mxu2 %v2671_v40  ;;  %810 = vmatpush.bf16.msra.mxu3 %v2675_v41  ;;  %v2712_v14 = vld [vmem:[%s3212_s18 + $0xf0] sm:$0xf0]  ;;  %v2718_v17 = vld [vmem:[%s3212_s18 + $0xd8] sm:$0xf]  ;;  %v758_v19 = vsel %vm4703_vm0, %v700_v6, 0  ;;  %v761_v20 = vsel %vm4703_vm0, %v701_v7, 0  ;;  %v2711_v23 = vor.u32 %v2816_v12, %v2710_v10 }
  0x3d   : > { %v2817_v18 = vld [vmem:[%s3212_s18 + $0xf4] sm:$0xf0]  ;;  %v2813_v21 = vld [vmem:[%s3212_s18 + $0xdc] sm:$0xf]  ;;  %v2715_v24 = vor.u32 %v2812_v13, %v2712_v14  ;;  %v2678_v25 = vld [vmem:[%s3212_s18 + $0x90] sm:$0xf] }
  0x3e   : > { %v2720_v22 = vld [vmem:[%s3212_s18 + $0xf8] sm:$0xf0]  ;;  %v2808_v26 = vld [vmem:[%s3212_s18 + $0xac] sm:$0xf0]  ;;  %v2719_v27 = vor.u32 %v2817_v18, %v2718_v17  ;;  %v2804_v29 = vld [vmem:[%s3212_s18 + $0x94] sm:$0xf] }
  0x3f   : > { %769 = vmatpush.bf16.msra.mxu0 %v2631_v51  ;;  %783 = vmatpush.bf16.msra.mxu1 %v2635_v52  ;;  %v2723_v28 = vor.u32 %v2813_v21, %v2720_v22  ;;  %v2680_v30 = vld [vmem:[%s3212_s18 + $0xb0] sm:$0xf0]  ;;  %v2686_v31 = vld [vmem:[%s3212_s18 + $0x98] sm:$0xf]  ;;  %v2805_v33 = vld [vmem:[%s3212_s18 + $0x9c] sm:$0xf]  ;;  %v2679_v36 = vor.u32 %v2808_v26, %v2678_v25 }
  0x40   : > { %797 = vmatpush.bf16.msra.mxu2 %v2639_v57  ;;  %811 = vmatpush.bf16.msra.mxu3 %v2643_v58  ;;  %v2809_v32 = vld [vmem:[%s3212_s18 + $0xb4] sm:$0xf0]  ;;  %v2688_v34 = vld [vmem:[%s3212_s18 + $0xb8] sm:$0xf0]  ;;  %v538_v35 = vld [vmem:[%s4690_s2 + $0x8] sm:$0xff]  ;;  %v2683_v37 = vor.u32 %v2804_v29, %v2680_v30  ;;  %v3076_v12 = vmov 0.0  }
  0x41   : > { %v2646_v38 = vld [vmem:[%s3212_s18 + $0x50] sm:$0xf]  ;;  %v2687_v40 = vor.u32 %v2809_v32, %v2686_v31  ;;  %v2691_v41 = vor.u32 %v2805_v33, %v2688_v34  ;;  %v2796_v42 = vld [vmem:[%s3212_s18 + $0x54] sm:$0xf]  ;;  %v2654_v44 = vld [vmem:[%s3212_s18 + $0x58] sm:$0xf] }
  0x42   : > { %v2800_v39 = vld [vmem:[%s3212_s18 + $0x6c] sm:$0xf0]  ;;  %v2648_v43 = vld [vmem:[%s3212_s18 + $0x70] sm:$0xf0]  ;;  %v2801_v45 = vld [vmem:[%s3212_s18 + $0x74] sm:$0xf0]  ;;  %546 = vperm.xlu0 %2896, %v538_v35  }
  0x43   : > { %770 = vmatpush.bf16.msra.mxu0 %v2599_v1  ;;  %784 = vmatpush.bf16.msra.mxu1 %v2603_v5  ;;  %v2797_v46 = vld [vmem:[%s3212_s18 + $0x5c] sm:$0xf]  ;;  %v2647_v48 = vor.u32 %v2800_v39, %v2646_v38  ;;  %v2651_v49 = vor.u32 %v2796_v42, %v2648_v43  ;;  %v2614_v50 = vld [vmem:[%s3212_s18 + $0x10] sm:$0xf]  ;;  %v2655_v52 = vor.u32 %v2801_v45, %v2654_v44  ;;  %v2788_v54 = vld [vmem:[%s3212_s18 + $0x14] sm:$0xf] }
  0x44   : > { %798 = vmatpush.bf16.msra.mxu2 %v2607_v8  ;;  %812 = vmatpush.bf16.msra.mxu3 %v2611_v9  ;;  %v2656_v47 = vld [vmem:[%s3212_s18 + $0x78] sm:$0xf0]  ;;  %v2792_v51 = vld [vmem:[%s3212_s18 + $0x2c] sm:$0xf0]  ;;  %v2616_v55 = vld [vmem:[%s3212_s18 + $0x30] sm:$0xf0] }
  0x45   : > { %v2659_v53 = vor.u32 %v2797_v46, %v2656_v47  ;;  %v2622_v56 = vld [vmem:[%s3212_s18 + $0x18] sm:$0xf]  ;;  %v2789_v58 = vld [vmem:[%s3212_s18 + $0x1c] sm:$0xf]  ;;  %v2615_v60 = vor.u32 %v2792_v51, %v2614_v50  ;;  %v2619_v61 = vor.u32 %v2788_v54, %v2616_v55  ;;  %v3321_v1 = vand.u32 127, %v354_v0 }
  0x46   : > { %2724 = vmatmul.msk.bf16.vlgmr.msra.gmra.mxu0 %vm734_vm1, %v3265_v11  ;;  %2725 = vmatmul.msk.bf16.vlgmr.msra.gmra.mxu1 %vm734_vm1, %v3265_v11  ;;  %v2793_v57 = vld [vmem:[%s3212_s18 + $0x34] sm:$0xf0]  ;;  %v2624_v59 = vld [vmem:[%s3212_s18 + $0x38] sm:$0xf0] }
  0x47   : > { %822 = vmatpush.bf16.msrb.mxu0 %v752_v15  ;;  %836 = vmatpush.bf16.msrb.mxu1 %v755_v16  ;;  %v2623_v62 = vor.u32 %v2793_v57, %v2622_v56  ;;  %v2627_v63 = vor.u32 %v2789_v58, %v2624_v59  ;;  %v356_v2 = vadd.s32 128, %v3321_v1  ;;  %v357_v4 = vadd.s32 256, %v3321_v1 }
  0x48   : > { %850 = vmatpush.bf16.msrb.mxu2 %v758_v19  ;;  %864 = vmatpush.bf16.msrb.mxu3 %v761_v20  ;;  %vm472_vm2 = vcmp.lt.s32.totalorder %v3321_v1, 16  ;;  %v358_v9 = vadd.s32 384, %v3321_v1  ;;  %v359_v16 = vadd.s32 512, %v3321_v1  ;;  %v360_v25 = vadd.s32 640, %v3321_v1 }
  0x49   : > { %2726 = vmatmul.msk.bf16.vlgmr.msra.gmra.mxu2 %vm734_vm1, %v3265_v11  ;;  %2727 = vmatmul.msk.bf16.vlgmr.msra.gmra.mxu3 %vm734_vm1, %v3265_v11  ;;  %v375_v3 = vand.u32 127, %v356_v2  ;;  %v382_v8 = vand.u32 127, %v357_v4  ;;  %v3336_v13 = vsel %vm472_vm2, 1.0, %v3076_v12  ;;  %v362_v38 = vadd.s32 896, %v3321_v1 }
  0x4a   : > { %v389_v15 = vand.u32 127, %v358_v9  ;;  %v403_v35 = vand.u32 127, %v360_v25 }
  0x4b   : > { %823 = vmatpush.bf16.msrb.mxu0 %v2711_v23  ;;  %837 = vmatpush.bf16.msrb.mxu1 %v2715_v24  ;;  %vm473_vm3 = vcmp.lt.s32.totalorder %v375_v3, 16  ;;  %vm474_vm4 = vcmp.lt.s32.totalorder %v382_v8, 16 }
  0x4c   : > { %851 = vmatpush.bf16.msrb.mxu2 %v2719_v27  ;;  %865 = vmatpush.bf16.msrb.mxu3 %v2723_v28  ;;  %v3339_v14 = vsel %vm473_vm3, 1.0, %v3076_v12  ;;  %v3347_v21 = vsel %vm474_vm4, 1.0, %v3076_v12  ;;  %vm475_vm5 = vcmp.lt.s32.totalorder %v389_v15, 16  ;;  %v396_v27 = vand.u32 127, %v359_v16 }
  0x4d   : > { %v3361_v32 = vsel %vm475_vm5, 1.0, %v3076_v12  ;;  %vm477_vm7 = vcmp.lt.s32.totalorder %v403_v35, 16 }
  0x4e   : > { %vm476_vm6 = vcmp.lt.s32.totalorder %v396_v27, 16  ;;  %v3389_v57 = vsel %vm477_vm7, 1.0, %v3076_v12  ;;  %vm1248_vm7 = vcmask 64512  }
  0x4f   : > { %824 = vmatpush.bf16.msrb.mxu0 %v2679_v36  ;;  %838 = vmatpush.bf16.msrb.mxu1 %v2683_v37  ;;  %v361_v37 = vadd.s32 768, %v3321_v1 }
  0x50   : > { %852 = vmatpush.bf16.msrb.mxu2 %v2687_v40  ;;  %866 = vmatpush.bf16.msrb.mxu3 %v2691_v41 }
  0x51   : > { %v410_v51 = vand.u32 127, %v361_v37 }
  0x53   : > { %825 = vmatpush.bf16.msrb.mxu0 %v2647_v48  ;;  %839 = vmatpush.bf16.msrb.mxu1 %v2651_v49  ;;  %v3381_v48 = vsel %vm476_vm6, 1.0, %v3076_v12  ;;  %vm478_vm8 = vcmp.lt.s32.totalorder %v410_v51, 16 }
  0x54   : > { %853 = vmatpush.bf16.msrb.mxu2 %v2655_v52  ;;  %867 = vmatpush.bf16.msrb.mxu3 %v2659_v53  ;;  %v417_v52 = vand.u32 127, %v362_v38  ;;  %v3404_v15 = vsel %vm478_vm8, 1.0, %v3076_v12 }
  0x56   : > { %vm479_vm9 = vcmp.lt.s32.totalorder %v417_v52, 16 }
  0x57   : > { %826 = vmatpush.bf16.msrb.mxu0 %v2615_v60  ;;  %840 = vmatpush.bf16.msrb.mxu1 %v2619_v61 }
  0x58   : > { %854 = vmatpush.bf16.msrb.mxu2 %v2623_v62  ;;  %868 = vmatpush.bf16.msrb.mxu3 %v2627_v63 }
  0x5a   : > { %2728 = vmatmul.msk.bf16.vlgmr.msrb.gmra.mxu0 %vm734_vm1, %v3265_v11  ;;  %2729 = vmatmul.msk.bf16.vlgmr.msrb.gmra.mxu1 %vm734_vm1, %v3265_v11 }
  0x5b   : > { %2730 = vmatmul.msk.bf16.vlgmr.msrb.gmra.mxu2 %vm734_vm1, %v3265_v11  ;;  %2731 = vmatmul.msk.bf16.vlgmr.msrb.gmra.mxu3 %vm734_vm1, %v3265_v11 }
  0xac   : > { %v3325_v5 = vpop.permute.xlu0 %541 }
  0xb4   : > { %v3353_v26 = vpop.permute.xlu0 %546 }
  0xc3   : > { %v772_v6 = vpop.f32.mrf.mxu0  ;;  %v786_v7 = vpop.f32.mrf.mxu1 }
  0xc4   : > { %v3330_v10 = vadd.f32 %v772_v6, %v3325_v5  ;;  %v3333_v11 = vadd.f32 %v786_v7, %v3325_v5 }
  0xc6   : > { %v875_v17 = vmul.f32 %v3336_v13, %v3330_v10  ;;  %v876_v18 = vmul.f32 %v3339_v14, %v3333_v11 }
  0xc8   : > { %v909_v28 = vmul.f32 %v875_v17, %v875_v17  ;;  %v910_v29 = vmul.f32 %v876_v18, %v876_v18  ;;  %v891_v36 = vadd.f32 %v876_v18, %v875_v17  ;;  %v3407_v18 = vsel %vm479_vm9, 1.0, %v3076_v12 }
  0xca   : > { %v925_v39 = vadd.f32 %v910_v29, %v909_v28 }
  0xcb   : > { %v774_v23 = vpop.f32.mrf.mxu0  ;;  %v788_v24 = vpop.f32.mrf.mxu1 }
  0xcc   : > { %v800_v19 = vpop.f32.mrf.mxu2  ;;  %v814_v20 = vpop.f32.mrf.mxu3  ;;  %v3364_v33 = vadd.f32 %v774_v23, %v3353_v26  ;;  %v3367_v34 = vadd.f32 %v788_v24, %v3353_v26 }
  0xcd   : > { %v3350_v22 = vadd.f32 %v800_v19, %v3325_v5  ;;  %v3358_v31 = vadd.f32 %v814_v20, %v3325_v5 }
  0xce   : > { %v883_v44 = vmul.f32 %v3336_v13, %v3364_v33  ;;  %v884_v45 = vmul.f32 %v3339_v14, %v3367_v34 }
  0xcf   : > { %v877_v30 = vmul.f32 %v3347_v21, %v3350_v22  ;;  %v878_v41 = vmul.f32 %v3361_v32, %v3358_v31 }
  0xd0   : > { %v917_v59 = vmul.f32 %v883_v44, %v883_v44  ;;  %v918_v60 = vmul.f32 %v884_v45, %v884_v45  ;;  %v900_v4 = vadd.f32 %v884_v45, %v883_v44 }
  0xd1   : > { %v911_v40 = vmul.f32 %v877_v30, %v877_v30  ;;  %v892_v47 = vadd.f32 %v891_v36, %v877_v30  ;;  %v912_v56 = vmul.f32 %v878_v41, %v878_v41 }
  0xd2   : > { %v934_v8 = vadd.f32 %v918_v60, %v917_v59 }
  0xd3   : > { %v926_v55 = vadd.f32 %v925_v39, %v911_v40  ;;  %v893_v63 = vadd.f32 %v892_v47, %v878_v41 }
  0xd4   : > { %v802_v42 = vpop.f32.mrf.mxu2  ;;  %v816_v43 = vpop.f32.mrf.mxu3 }
  0xd5   : > { %v3378_v46 = vadd.f32 %v802_v42, %v3353_v26  ;;  %v3395_v61 = vadd.f32 %v816_v43, %v3353_v26  ;;  %v927_v3 = vadd.f32 %v926_v55, %v912_v56 }
  0xd7   : > { %v828_v49 = vpop.f32.mrf.mxu0  ;;  %v842_v50 = vpop.f32.mrf.mxu1  ;;  %v885_v53 = vmul.f32 %v3347_v21, %v3378_v46  ;;  %v886_v9 = vmul.f32 %v3361_v32, %v3395_v61 }
  0xd8   : > { %v3386_v54 = vadd.f32 %v828_v49, %v3325_v5  ;;  %v3392_v58 = vadd.f32 %v842_v50, %v3325_v5 }
  0xd9   : > { %v919_v0 = vmul.f32 %v885_v53, %v885_v53  ;;  %v901_v19 = vadd.f32 %v900_v4, %v885_v53 }
  0xda   : > { %v879_v62 = vmul.f32 %v3381_v48, %v3386_v54  ;;  %v880_v7 = vmul.f32 %v3389_v57, %v3392_v58 }
  0xdb   : > { %v935_v28 = vadd.f32 %v934_v8, %v919_v0  ;;  %v902_v40 = vadd.f32 %v901_v19, %v886_v9 }
  0xdc   : > { %v913_v2 = vmul.f32 %v879_v62, %v879_v62  ;;  %v894_v6 = vadd.f32 %v893_v63, %v879_v62  ;;  %v914_v35 = vmul.f32 %v880_v7, %v880_v7 }
  0xde   : > { %v856_v16 = vpop.f32.mrf.mxu2  ;;  %v870_v17 = vpop.f32.mrf.mxu3  ;;  %v928_v27 = vadd.f32 %v927_v3, %v913_v2  ;;  %v895_v38 = vadd.f32 %v894_v6, %v880_v7 }
  0xdf   : > { %v3410_v20 = vadd.f32 %v856_v16, %v3325_v5  ;;  %v3413_v23 = vadd.f32 %v870_v17, %v3325_v5  ;;  %v830_v24 = vpop.f32.mrf.mxu0  ;;  %v844_v25 = vpop.f32.mrf.mxu1  ;;  %v920_v5 = vmul.f32 %v886_v9, %v886_v9 }
  0xe0   : > { %v3416_v29 = vadd.f32 %v830_v24, %v3353_v26  ;;  %v3419_v30 = vadd.f32 %v844_v25, %v3353_v26  ;;  %v929_v43 = vadd.f32 %v928_v27, %v914_v35 }
  0xe1   : > { %v881_v36 = vmul.f32 %v3404_v15, %v3410_v20  ;;  %v882_v37 = vmul.f32 %v3407_v18, %v3413_v23  ;;  %v936_v44 = vadd.f32 %v935_v28, %v920_v5  ;;  %v3077_v5 = vmov 2048.0  }
  0xe2   : > { %v887_v39 = vmul.f32 %v3381_v48, %v3416_v29  ;;  %v888_v47 = vmul.f32 %v3389_v57, %v3419_v30  ;;  %2899 = vrcp.f32 %v3077_v5  ;;  %v1445_v5 = vld [vmem:[%s4694_s6] sm:$0xff] }
  0xe3   : > { %v896_v41 = vadd.f32 %v895_v38, %v881_v36  ;;  %v915_v42 = vmul.f32 %v881_v36, %v881_v36  ;;  %v916_v51 = vmul.f32 %v882_v37, %v882_v37 }
  0xe4   : > { %v921_v45 = vmul.f32 %v887_v39, %v887_v39  ;;  %v903_v49 = vadd.f32 %v902_v40, %v887_v39  ;;  %v922_v0 = vmul.f32 %v888_v47, %v888_v47 }
  0xe5   : > { %v897_v50 = vadd.f32 %v896_v41, %v882_v37  ;;  %v930_v52 = vadd.f32 %v929_v43, %v915_v42 }
  0xe6   : > { %v858_v53 = vpop.f32.mrf.mxu2  ;;  %v872_v55 = vpop.f32.mrf.mxu3  ;;  %v937_v56 = vadd.f32 %v936_v44, %v921_v45  ;;  %v904_v63 = vadd.f32 %v903_v49, %v888_v47 }
  0xe7   : > { %v3430_v59 = vadd.f32 %v858_v53, %v3353_v26  ;;  %v3433_v60 = vadd.f32 %v872_v55, %v3353_v26  ;;  %898 = vadd.xlane.f32.xlu1 %v897_v50  ;;  %v931_v62 = vadd.f32 %v930_v52, %v916_v51 }
  0xe8   : > { %v938_v7 = vadd.f32 %v937_v56, %v922_v0  ;;  %v2900_v39 = vpop.eup %2899 }
  0xe9   : > { %v889_v2 = vmul.f32 %v3404_v15, %v3430_v59  ;;  %v890_v3 = vmul.f32 %v3407_v18, %v3433_v60  ;;  %932 = vadd.xlane.f32.xlu2 %v931_v62  ;;  %v957_v40 = vmul.f32 2048.0, %v2900_v39  ;;  %vm961_vm11 = vweird.f32 %v2900_v39 }
  0xeb   : > { %v923_v4 = vmul.f32 %v889_v2, %v889_v2  ;;  %v905_v6 = vadd.f32 %v904_v63, %v889_v2  ;;  %v924_v9 = vmul.f32 %v890_v3, %v890_v3  ;;  %v958_v41 = vsub.f32 1.0, %v957_v40  ;;  %v1007_v40 = vld [vmem:[%s4692_s4] sm:$0xff] }
  0xed   : > { %v906_v8 = vadd.f32 %v905_v6, %v890_v3  ;;  %v939_v16 = vadd.f32 %v938_v7, %v923_v4  ;;  %v959_v49 = vmul.f32 %v2900_v39, %v958_v41 }
  0xef   : > { %907 = vadd.xlane.f32.xlu1 %v906_v8  ;;  %v940_v26 = vadd.f32 %v939_v16, %v924_v9  ;;  %v960_v55 = vadd.f32 %v2900_v39, %v959_v49 }
  0xf1   : > { %941 = vadd.xlane.f32.xlu2 %v940_v26  ;;  %v962_v0 = vsel %vm961_vm11, %v2900_v39, %v960_v55 }
 0x15a   : > { %v899_v17 = vpop.xlane.xlu1 %898 }
 0x15b   : > { %v944_v25 = vsel %vm4702_vm10, %v899_v17, 0.0 }
 0x15c   : > { %v933_v19 = vpop.xlane.xlu2 %932 }
 0x15d   : > { %v965_v36 = vsel %vm4702_vm10, %v933_v19, 0.0  ;;  %v990_v19 = vld [vmem:[%s4691_s3 + $0x8] sm:$0xff] }
 0x162   : > { %v908_v24 = vpop.xlane.xlu1 %907 }
 0x163   : > { %v945_v27 = vsel %vm4702_vm10, %v908_v24, 0.0 }
 0x164   : > { %v942_v28 = vpop.xlane.xlu2 %941  ;;  %v946_v35 = vadd.f32 %v945_v27, %v944_v25 }
 0x165   : > { %v966_v37 = vsel %vm4702_vm10, %v942_v28, 0.0  ;;  %v1008_v28 = vld [vmem:[%s4692_s4 + $0x8] sm:$0xff] }
 0x166   : > { %947 = vadd.xlane.f32.xlu0 %v946_v35  ;;  %v967_v38 = vadd.f32 %v966_v37, %v965_v36  ;;  %v989_v37 = vld [vmem:[%s4691_s3] sm:$0xff] }
 0x168   : > { %968 = vadd.xlane.f32.xlu1 %v967_v38 }
 0x1d9   : > { %v948_v42 = vpop.xlane.xlu0 %947 }
 0x1da   : > { %v949_v43 = vrot.slane %v948_v42, 4 }
 0x1db   : > { %v969_v44 = vpop.xlane.xlu1 %968 }
 0x1dc   : > { %v950_v45 = vadd.f32 %v949_v43, %v948_v42  ;;  %v970_v47 = vrot.slane %v969_v44, 4  ;;  %v1446_v42 = vld [vmem:[%s4694_s6 + $0x8] sm:$0xff] }
 0x1de   : > { %v951_v50 = vrot.slane %v950_v45, 2  ;;  %v971_v51 = vadd.f32 %v970_v47, %v969_v44 }
 0x1e0   : > { %v972_v52 = vrot.slane %v971_v51, 2  ;;  %v952_v53 = vadd.f32 %v951_v50, %v950_v45 }
 0x1e2   : > { %v953_v56 = vrot.slane %v952_v53, 1  ;;  %v973_v62 = vadd.f32 %v972_v52, %v971_v51 }
 0x1e4   : > { %v954_v63 = vadd.f32 %v953_v56, %v952_v53  ;;  %v974_v2 = vrot.slane %v973_v62, 1 }
 0x1e6   : > { %2824 = vpush %v954_v63  ;;  %v975_v3 = vadd.f32 %v974_v2, %v973_v62 }
 0x1e7   : > { %2826 = vpush %v962_v0 }
 0x1e8   : > { %2828 = vpush %v975_v3 }
 0x217   : > { %s2825_s17 = spop %2824 }
 0x218   : > { %s2827_s23 = spop %2826 }
 0x219   : > { %s3443_s25 = smul.f32 %s2827_s23, %s2825_s17  ;;  %s2829_s26 = spop %2828 }
 0x21a   : > { %s985_s22 = smul.f32 %s2829_s26, %s2827_s23 }
 0x21b   : > { %s986_s24 = smul.f32 %s3443_s25, %s3443_s25  ;;  %v1009_v27 = vstv %s3443_s25 }
 0x21d   : > { %s987_s11 = ssub.f32 %s985_s22, %s986_s24 }
 0x21f   : > { %s988_s18 = smax.f32 %s3078_s15, %s987_s11 }
 0x220   : > { %s991_s19 = sadd.f32 1e-05, %s988_s18 }
 0x222   : > { %v992_v4 = vstv %s991_s19  ;;  %s2490_s19 = scalar_lea.sflag [#allocation4], %s3208_s27 }
 0x223   : > { %2901 = vrsqrt.f32 %v992_v4  ;;  %vm999_vm13 = vweird.f32 %v992_v4 }
 0x229   : > { %v2902_v6 = vpop.eup %2901 }
 0x22a   : > { %v994_v7 = vmul.f32 %v2902_v6, %v992_v4  ;;  %vm1000_vm12 = vweird.f32 %v2902_v6 }
 0x22b   : > { %vm1001_vm14 = vmor %vm999_vm13, %vm1000_vm12 }
 0x22c   : > { %v995_v8 = vmul.f32 %v2902_v6, %v994_v7 }
 0x22e   : > { %v996_v9 = vmul.f32 0.5, %v995_v8 }
 0x230   : > { %v997_v16 = vsub.f32 1.5, %v996_v9 }
 0x232   : > { %v998_v26 = vmul.f32 %v2902_v6, %v997_v16 }
 0x234   : > { %v1002_v17 = vsel %vm1001_vm14, %v2902_v6, %v998_v26 }
 0x235   : > { %2830 = vpush %v1002_v17 }
 0x266   : > { %s2831_s29 = spop %2830 }
 0x267   : > { %v1004_v24 = vstv %s2831_s29 }
 0x268   : > { %v1006_v25 = vmul.f32 %v1004_v24, %v990_v19  ;;  %v1005_v38 = vmul.f32 %v1004_v24, %v989_v37 }
 0x26a   : > { %v1011_v35 = vmul.f32 %v1009_v27, %v1006_v25  ;;  %1021 = vperm.xlu2 %2897, %v1006_v25   ;;  %v1010_v39 = vmul.f32 %v1009_v27, %v1005_v38 }
 0x26c   : > { %v1013_v36 = vsub.f32 %v1008_v28, %v1011_v35  ;;  %v1012_v41 = vsub.f32 %v1007_v40, %v1010_v39 }
 0x26e   : > { %1047 = vperm.xlu1 %2898, %v1013_v36  }
 0x272   : > { %1016 = vperm.xlu2 %2897, %v1005_v38  }
 0x276   : > { %1449 = vperm.xlu1 %2898, %v1445_v5  }
 0x27a   : > { %1042 = vperm.xlu2 %2897, %v1012_v41  }
 0x282   : > { %1454 = vperm.xlu2 %2897, %v1446_v42  }
 0x2c4   : > { %v1022_v43 = vpop.permute.xlu2 %1021 }
 0x2c5   : > { %v1032_v44 = vmul.f32 %v1022_v43, %v3364_v33  ;;  %v1033_v45 = vmul.f32 %v1022_v43, %v3367_v34  ;;  %v1034_v47 = vmul.f32 %v1022_v43, %v3378_v46  ;;  %v1035_v49 = vmul.f32 %v1022_v43, %v3395_v61 }
 0x2c6   : > { %v1036_v50 = vmul.f32 %v1022_v43, %v3416_v29  ;;  %v1037_v51 = vmul.f32 %v1022_v43, %v3419_v30  ;;  %v1038_v33 = vmul.f32 %v1022_v43, %v3430_v59  ;;  %v1039_v30 = vmul.f32 %v1022_v43, %v3433_v60 }
 0x2cc   : > { %v3473_v63 = vpop.permute.xlu2 %1016 }
 0x2cd   : > { %v1024_v60 = vmul.f32 %v3473_v63, %v3330_v10  ;;  %v1025_v27 = vmul.f32 %v3473_v63, %v3333_v11  ;;  %v1026_v28 = vmul.f32 %v3473_v63, %v3350_v22  ;;  %v1027_v35 = vmul.f32 %v3473_v63, %v3358_v31 }
 0x2ce   : > { %v1028_v10 = vmul.f32 %v3473_v63, %v3386_v54  ;;  %v3500_v38 = vmul.f32 %v3473_v63, %v3392_v58 }
 0x2d4   : > { %v3477_v59 = vpop.permute.xlu2 %1042 }
 0x2d5   : > { %v3493_v37 = vadd.f32 %v3477_v59, %v1024_v60  ;;  %v3503_v22 = vadd.f32 %v3477_v59, %v1025_v27  ;;  %v3516_v42 = vadd.f32 %v3477_v59, %v1026_v28 }
 0x2e0   : > { %v1048_v52 = vpop.permute.xlu1 %1047 }
 0x2e1   : > { %v1058_v53 = vadd.f32 %v1048_v52, %v1032_v44  ;;  %v1059_v55 = vadd.f32 %v1048_v52, %v1033_v45  ;;  %v1060_v56 = vadd.f32 %v1048_v52, %v1034_v47  ;;  %v1061_v62 = vadd.f32 %v1048_v52, %v1035_v49 }
 0x2e2   : > { %v1062_v0 = vadd.f32 %v1048_v52, %v1036_v50  ;;  %v1063_v2 = vadd.f32 %v1048_v52, %v1037_v51  ;;  %v1064_v61 = vadd.f32 %v1048_v52, %v1038_v33  ;;  %v1065_v7 = vadd.f32 %v1048_v52, %v1039_v30 }
 0x2e3   : > { %v2732_v34 = vmul.f32 -1.442695, %v1058_v53  ;;  %v2733_v3 = vmul.f32 -1.442695, %v1059_v55  ;;  %v2734_v46 = vmul.f32 -1.442695, %v1060_v56  ;;  %v3521_v45 = vadd.f32 %v3477_v59, %v1027_v35 }
 0x2e4   : > { %v2735_v4 = vmul.f32 -1.442695, %v1061_v62  ;;  %v2736_v29 = vmul.f32 -1.442695, %v1062_v0  ;;  %v2737_v6 = vmul.f32 -1.442695, %v1063_v2  ;;  %v3525_v47 = vadd.f32 %v3477_v59, %v1028_v10 }
 0x2e5   : > { %2903 = vpow2.f32 %v2732_v34  ;;  %v2738_v8 = vmul.f32 -1.442695, %v1064_v61  ;;  %v2739_v26 = vmul.f32 -1.442695, %v1065_v7 }
 0x2e6   : > { %2905 = vpow2.f32 %v2733_v3 }
 0x2e7   : > { %2907 = vpow2.f32 %v2734_v46 }
 0x2e8   : > { %2909 = vpow2.f32 %v2735_v4 }
 0x2e9   : > { %2911 = vpow2.f32 %v2736_v29 }
 0x2ea   : > { %2913 = vpow2.f32 %v2737_v6 }
 0x2eb   : > { %v2904_v9 = vpop.eup %2903  ;;  %2915 = vpow2.f32 %v2738_v8 }
 0x2ec   : > { %v2906_v16 = vpop.eup %2905  ;;  %v3479_v17 = vadd.f32 1.0, %v2904_v9 }
 0x2ed   : > { %v2908_v19 = vpop.eup %2907  ;;  %v3483_v24 = vadd.f32 1.0, %v2906_v16 }
 0x2ee   : > { %v2910_v25 = vpop.eup %2909  ;;  %2917 = vrcp.f32 %v3479_v17  ;;  %v3505_v5 = vadd.f32 1.0, %v2908_v19  ;;  %v1107_v39 = vand.u32 2147483647, %v3479_v17  ;;  %v1109_v40 = vand.u32 2147483648, %v3479_v17 }
 0x2ef   : > { %v2912_v36 = vpop.eup %2911  ;;  %2919 = vrcp.f32 %v3483_v24  ;;  %v3507_v31 = vadd.f32 1.0, %v2910_v25  ;;  %v1124_v41 = vand.u32 2147483648, %v3483_v24  ;;  %v1122_v58 = vand.u32 2147483647, %v3483_v24 }
 0x2f0   : > { %v2914_v11 = vpop.eup %2913  ;;  %2921 = vpow2.f32 %v2739_v26  ;;  %v3512_v54 = vadd.f32 1.0, %v2912_v36  ;;  %v1139_v43 = vand.u32 2147483648, %v3505_v5  ;;  %vm1103_vm15 = vweird.f32 %v3479_v17 }
 0x2f1   : > { %2923 = vrcp.f32 %v3505_v5  ;;  %v2916_v44 = vpop.eup %2915  ;;  %v3527_v49 = vadd.f32 1.0, %v2914_v11  ;;  %vm1118_vm1 = vweird.f32 %v3483_v24  ;;  %v1154_v51 = vand.u32 2147483648, %v3507_v31 }
 0x2f2   : > { %2925 = vrcp.f32 %v3507_v31  ;;  %vm3534_vm2 = vcmp.eq.f32.partialorder %v1107_v39, 8.507059e+37  ;;  %v1110_v56 = vor.u32 1.1754944e-38, %v1109_v40  ;;  %v1125_v62 = vor.u32 1.1754944e-38, %v1124_v41 }
 0x2f3   : > { %2927 = vrcp.f32 %v3512_v54  ;;  %v1137_v0 = vand.u32 2147483647, %v3505_v5  ;;  %vm3540_vm3 = vcmp.eq.f32.partialorder %v1122_v58, 8.507059e+37  ;;  %v3544_v3 = vor.u32 1.1754944e-38, %v1139_v43 }
 0x2f4   : > { %v2918_v50 = vpop.eup %2917  ;;  %v1152_v46 = vand.u32 2147483647, %v3507_v31  ;;  %v1169_v4 = vand.u32 2147483648, %v3512_v54  ;;  %vm1133_vm5 = vweird.f32 %v3505_v5  ;;  %v1167_v29 = vand.u32 2147483647, %v3512_v54 }
 0x2f5   : > { %v2920_v52 = vpop.eup %2919  ;;  %v1099_v53 = vmul.f32 %v2918_v50, %v3479_v17  ;;  %vm1104_vm4 = vweird.f32 %v2918_v50  ;;  %2929 = vrcp.f32 %v3527_v49  ;;  %v1155_v7 = vor.u32 1.1754944e-38, %v1154_v51 }
 0x2f6   : > { %v2922_v2 = vpop.eup %2921  ;;  %v1114_v33 = vmul.f32 %v2920_v52, %v3483_v24  ;;  %vm1119_vm6 = vweird.f32 %v2920_v52  ;;  %v1182_v8 = vand.u32 2147483647, %v3527_v49  ;;  %vm3554_vm8 = vcmp.eq.f32.partialorder %v1137_v0, 8.507059e+37  ;;  %vm1105_vm0 = vmor %vm1103_vm15, %vm1104_vm4 }
 0x2f7   : > { %v1100_v61 = vsub.f32 1.0, %v1099_v53  ;;  %v2924_v30 = vpop.eup %2923  ;;  %v1170_v60 = vor.u32 1.1754944e-38, %v1169_v4  ;;  %v1184_v25 = vand.u32 2147483648, %v3527_v49  ;;  %vm3561_vm13 = vcmp.eq.f32.partialorder %v1152_v46, 8.507059e+37  ;;  %vm1120_vm14 = vmor %vm1118_vm1, %vm1119_vm6 }
 0x2f8   : > { %v1115_v6 = vsub.f32 1.0, %v1114_v33  ;;  %v2926_v9 = vpop.eup %2925  ;;  %v1129_v26 = vmul.f32 %v2924_v30, %v3505_v5  ;;  %vm1134_vm11 = vweird.f32 %v2924_v30  ;;  %vm3566_vm10 = vcmp.eq.f32.partialorder %v1167_v29, 8.507059e+37 }
 0x2f9   : > { %v1101_v16 = vmul.f32 %v2918_v50, %v1100_v61  ;;  %v2928_v27 = vpop.eup %2927  ;;  %v1144_v35 = vmul.f32 %v2926_v9, %v3507_v31  ;;  %vm1149_vm12 = vweird.f32 %v2926_v9  ;;  %vm1178_vm9 = vweird.f32 %v3527_v49 }
 0x2fa   : > { %v1116_v28 = vmul.f32 %v2920_v52, %v1115_v6  ;;  %v1130_v11 = vsub.f32 1.0, %v1129_v26  ;;  %v1159_v39 = vmul.f32 %v2928_v27, %v3512_v54  ;;  %v3574_v43 = vadd.f32 1.0, %v2916_v44 }
 0x2fb   : > { %v1102_v10 = vadd.f32 %v2918_v50, %v1101_v16  ;;  %v1145_v58 = vsub.f32 1.0, %v1144_v35  ;;  %v3576_v51 = vadd.f32 1.0, %v2922_v2  ;;  %v2930_v53 = vpop.eup %2929  ;;  %vm4722_vm1 = vweird.f32 %v3507_v31  ;;  %v3608_v35 = vld [vmem:[%s4693_s5] sm:$0xff] }
 0x2fc   : > { %v1117_v41 = vadd.f32 %v2920_v52, %v1116_v28  ;;  %v1131_v33 = vmul.f32 %v2924_v30, %v1130_v11  ;;  %v1160_v46 = vsub.f32 1.0, %v1159_v39  ;;  %v1174_v29 = vmul.f32 %v2930_v53, %v3527_v49 }
 0x2fd   : > { %v1106_v0 = vsel %vm1105_vm0, %v2918_v50, %v1102_v10  ;;  %v1146_v61 = vmul.f32 %v2926_v9, %v1145_v58  ;;  %vm1135_vm0 = vmor %vm1133_vm5, %vm1134_vm11  ;;  %vm1179_vm15 = vweird.f32 %v2930_v53  ;;  %2931 = vrcp.f32 %v3574_v43 }
 0x2fe   : > { %v1111_v17 = vsel %vm3534_vm2, %v1110_v56, %v1106_v0  ;;  %v1121_v4 = vsel %vm1120_vm14, %v2920_v52, %v1117_v41  ;;  %v1132_v50 = vadd.f32 %v2924_v30, %v1131_v33  ;;  %v1161_v6 = vmul.f32 %v2928_v27, %v1160_v46  ;;  %vm1150_vm2 = vmor %vm4722_vm1, %vm1149_vm12 }
 0x2ff   : > { %v1218_v44 = vmul.f32 %v1111_v17, %v3493_v37  ;;  %v1126_v2 = vsel %vm3540_vm3, %v1125_v62, %v1121_v4  ;;  %v1147_v16 = vadd.f32 %v2926_v9, %v1146_v61  ;;  %v1175_v55 = vsub.f32 1.0, %v1174_v29  ;;  %vm1180_vm11 = vmor %vm1178_vm9, %vm1179_vm15 }
 0x300   : > { %v1219_v24 = vmul.f32 %v1126_v2, %v3503_v22  ;;  %v1136_v56 = vsel %vm1135_vm0, %v2924_v30, %v1132_v50  ;;  %v1162_v37 = vadd.f32 %v2928_v27, %v1161_v6  ;;  %vm4723_vm3 = vweird.f32 %v2928_v27 }
 0x301   : > { %v1226_v52 = vpack.c.bf16 %v1218_v44, %v1218_v44  ;;  %v1141_v22 = vsel %vm3554_vm8, %v3544_v3, %v1136_v56  ;;  %v1151_v34 = vsel %vm1150_vm2, %v2926_v9, %v1147_v16  ;;  %vm4724_vm4 = vweird.f32 %v3512_v54 }
 0x302   : > { %v1227_v62 = vpack.c.bf16 %v1219_v24, %v1219_v24  ;;  %vm1165_vm5 = vmor %vm4724_vm4, %vm4723_vm3  ;;  %v1176_v5 = vmul.f32 %v2930_v53, %v1175_v55  ;;  %vm4725_vm6 = vcmask 1043456   ;;  %v1220_v26 = vmul.f32 %v1141_v22, %v3516_v42 }
 0x303   : > { %v1256_v30 = vsel %vm4725_vm6, %v1226_v52, 0  ;;  %v1156_v31 = vsel %vm3561_vm13, %v1155_v7, %v1151_v34  ;;  %v1166_v28 = vsel %vm1165_vm5, %v2928_v27, %v1162_v37  ;;  %vm4726_vm8 = vmmov %vm4725_vm6  ;;  %v1055_v7 = vadd.f32 %v3477_v59, %v3500_v38 }
 0x304   : > { %1286 = vmatpush.bf16.msra.mxu0 %v1256_v30  ;;  %v1259_v3 = vsel %vm4726_vm8, %v1227_v62, 0  ;;  %v1221_v54 = vmul.f32 %v1156_v31, %v3521_v45  ;;  %v1171_v9 = vsel %vm3566_vm10, %v1170_v60, %v1166_v28  ;;  %v1177_v19 = vadd.f32 %v2930_v53, %v1176_v5  ;;  %v2932_v45 = vpop.eup %2931  ;;  %vm4727_vm10 = vmmov %vm4725_vm6 }
 0x305   : > { %1305 = vmatpush.bf16.msra.mxu1 %v1259_v3  ;;  %v1228_v42 = vpack.c.bf16 %v1220_v26, %v1220_v26  ;;  %v1222_v36 = vmul.f32 %v1171_v9, %v3525_v47  ;;  %v1185_v27 = vor.u32 1.1754944e-38, %v1184_v25  ;;  %vm1183_vm12 = vcmp.eq.f32.partialorder %v1182_v8, 8.507059e+37  ;;  %vm4728_vm13 = vmmov %vm4725_vm6 }
 0x306   : > { %v1229_v10 = vpack.c.bf16 %v1221_v54, %v1221_v54  ;;  %v1181_v11 = vsel %vm1180_vm11, %v2930_v53, %v1177_v19  ;;  %2933 = vrcp.f32 %v3576_v51  ;;  %v1189_v25 = vmul.f32 %v2932_v45, %v3574_v43  ;;  %vm4729_vm9 = vmmov %vm4725_vm6 }
 0x307   : > { %v1262_v60 = vsel %vm4727_vm10, %v1228_v42, 0  ;;  %v1230_v39 = vpack.c.bf16 %v1222_v36, %v1222_v36  ;;  %v1186_v47 = vsel %vm1183_vm12, %v1185_v27, %v1181_v11  ;;  %2748 = vmatmul.msk.bf16.vlgmr.msra.gmra.mxu0 %vm1248_vm7, %v3608_v35  ;;  %v1199_v58 = vand.u32 2147483648, %v3574_v43  ;;  %vm4730_vm14 = vmmov %vm4725_vm6 }
 0x308   : > { %1324 = vmatpush.bf16.msra.mxu2 %v1262_v60  ;;  %v1265_v38 = vsel %vm4728_vm13, %v1229_v10, 0  ;;  %v1223_v40 = vmul.f32 %v1186_v47, %v1055_v7  ;;  %2750 = vmatmul.msk.bf16.vlgmr.msra.gmra.mxu1 %vm1248_vm7, %v3608_v35  ;;  %v1190_v41 = vsub.f32 1.0, %v1189_v25  ;;  %vm1194_vm0 = vweird.f32 %v2932_v45  ;;  %vm4731_vm11 = vmmov %vm4726_vm8 }
 0x309   : > { %1343 = vmatpush.bf16.msra.mxu3 %v1265_v38  ;;  %v1268_v49 = vsel %vm4729_vm9, %v1230_v39, 0  ;;  %v1197_v46 = vand.u32 2147483647, %v3574_v43  ;;  %v1030_v4 = vmul.f32 %v3473_v63, %v3410_v20  ;;  %vm1193_vm15 = vweird.f32 %v3574_v43  ;;  %v2819_v43 = vld [vmem:[%s4693_s5 + $0x8] sm:$0xff]  ;;  %v3670_v38 = vpop.permute.xlu1 %1449 }
 0x30a   : > { %1362 = vmatpush.bf16.msrb.mxu0 %v1268_v49  ;;  %v1231_v8 = vpack.c.bf16 %v1223_v40, %v1223_v40  ;;  %v1191_v33 = vmul.f32 %v2932_v45, %v1190_v41  ;;  %vm1195_vm1 = vmor %vm1193_vm15, %vm1194_vm0  ;;  %v1200_v29 = vor.u32 1.1754944e-38, %v1199_v58  ;;  %v1214_v6 = vand.u32 2147483648, %v3576_v51 }
 0x30b   : > { %2752 = vmatmul.msk.bf16.vlgmr.msra.gmra.mxu2 %vm1248_vm7, %v3608_v35  ;;  %v1056_v2 = vadd.f32 %v3477_v59, %v1030_v4  ;;  %vm1198_vm2 = vcmp.eq.f32.partialorder %v1197_v46, 8.507059e+37  ;;  %v1212_v55 = vand.u32 2147483647, %v3576_v51  ;;  %v1031_v20 = vmul.f32 %v3473_v63, %v3413_v23 }
 0x30c   : > { %v2934_v53 = vpop.eup %2933  ;;  %v1271_v0 = vsel %vm4730_vm14, %v1231_v8, 0  ;;  %2754 = vmatmul.msk.bf16.vlgmr.msra.gmra.mxu3 %vm1248_vm7, %v3608_v35  ;;  %v1192_v61 = vadd.f32 %v2932_v45, %v1191_v33  ;;  %vm1208_vm4 = vweird.f32 %v3576_v51  ;;  %v1215_v62 = vor.u32 1.1754944e-38, %v1214_v6 }
 0x30d   : > { %1381 = vmatpush.bf16.msrb.mxu1 %v1271_v0  ;;  %v1204_v17 = vmul.f32 %v2934_v53, %v3576_v51  ;;  %vm1209_vm3 = vweird.f32 %v2934_v53  ;;  %v1057_v22 = vadd.f32 %v3477_v59, %v1031_v20  ;;  %vm1213_vm6 = vcmp.eq.f32.partialorder %v1212_v55, 8.507059e+37 }
 0x30e   : > { %v1196_v50 = vsel %vm1195_vm1, %v2932_v45, %v1192_v61  ;;  %vm1210_vm5 = vmor %vm1208_vm4, %vm1209_vm3  ;;  %vm4732_vm12 = vcmask 7168  }
 0x30f   : > { %v1205_v44 = vsub.f32 1.0, %v1204_v17  ;;  %v1201_v24 = vsel %vm1198_vm2, %v1200_v29, %v1196_v50  ;;  %vm4733_vm10 = vmmov %vm4732_vm12 }
 0x310   : > { %v1224_v52 = vmul.f32 %v1201_v24, %v1056_v2  ;;  %vm4734_vm13 = vmmov %vm4733_vm10 }
 0x311   : > { %v1206_v16 = vmul.f32 %v2934_v53, %v1205_v44  ;;  %v3688_v44 = vpop.permute.xlu2 %1454  ;;  %vm4735_vm9 = vmmov %vm4733_vm10 }
 0x312   : > { %v1232_v37 = vpack.c.bf16 %v1224_v52, %v1224_v52 }
 0x313   : > { %v1207_v56 = vadd.f32 %v2934_v53, %v1206_v16 }
 0x314   : > { %v1274_v5 = vsel %vm4726_vm8, %v1232_v37, 0 }
 0x315   : > { %v1211_v34 = vsel %vm1210_vm5, %v2934_v53, %v1207_v56  ;;  %1400 = vmatpush.bf16.msrb.mxu2 %v1274_v5 }
 0x316   : > { %v1216_v30 = vsel %vm1213_vm6, %v1215_v62, %v1211_v34  ;;  %v363_v62 = vadd.s32 1024, %v3321_v1 }
 0x317   : > { %v1225_v26 = vmul.f32 %v1216_v30, %v1057_v22  ;;  %2749 = vmatmul.msk.bf16.gmra.mxu0 %vm1248_vm7, %v2819_v43 }
 0x318   : > { %2751 = vmatmul.msk.bf16.gmra.mxu1 %vm1248_vm7, %v2819_v43 }
 0x319   : > { %v1233_v23 = vpack.c.bf16 %v1225_v26, %v1225_v26 }
 0x31b   : > { %v1277_v63 = vsel %vm4731_vm11, %v1233_v23, 0  ;;  %2753 = vmatmul.msk.bf16.gmra.mxu2 %vm1248_vm7, %v2819_v43 }
 0x31c   : > { %1419 = vmatpush.bf16.msrb.mxu3 %v1277_v63 }
 0x31d   : > { %2755 = vmatmul.msk.bf16.gmra.mxu3 %vm1248_vm7, %v2819_v43 }
 0x327   : > { %2756 = vmatmul.msk.bf16.vlgmr.msrb.gmra.mxu0 %vm1248_vm7, %v3608_v35 }
 0x328   : > { %2758 = vmatmul.msk.bf16.vlgmr.msrb.gmra.mxu1 %vm1248_vm7, %v3608_v35 }
 0x32b   : > { %2760 = vmatmul.msk.bf16.vlgmr.msrb.gmra.mxu2 %vm1248_vm7, %v3608_v35 }
 0x32d   : > { %2762 = vmatmul.msk.bf16.vlgmr.msrb.gmra.mxu3 %vm1248_vm7, %v3608_v35 }
 0x337   : > { %2757 = vmatmul.msk.bf16.gmra.mxu0 %vm1248_vm7, %v2819_v43 }
 0x338   : > { %2759 = vmatmul.msk.bf16.gmra.mxu1 %vm1248_vm7, %v2819_v43 }
 0x33b   : > { %2761 = vmatmul.msk.bf16.gmra.mxu2 %vm1248_vm7, %v2819_v43 }
 0x33d   : > { %2763 = vmatmul.msk.bf16.gmra.mxu3 %vm1248_vm7, %v2819_v43 }
 0x384   : > { %v1288_v59 = vpop.f32.mrf.mxu0 }
 0x385   : > { %v1307_v51 = vpop.f32.mrf.mxu1  ;;  %v3676_v25 = vadd.f32 %v3670_v38, %v1288_v59 }
 0x387   : > { %v1475_v46 = vmul.f32 %v3336_v13, %v3676_v25 }
 0x389   : > { %v1513_v24 = vmul.f32 %v1475_v46, %v1475_v46 }
 0x38c   : > { %v1290_v31 = vpop.f32.mrf.mxu0 }
 0x38d   : > { %v1309_v28 = vpop.f32.mrf.mxu1  ;;  %v3694_v6 = vadd.f32 %v3688_v44, %v1290_v31 }
 0x38e   : > { %v1326_v3 = vpop.f32.mrf.mxu2 }
 0x38f   : > { %v1345_v54 = vpop.f32.mrf.mxu3  ;;  %v1484_v23 = vmul.f32 %v3336_v13, %v3694_v6 }
 0x394   : > { %v1293_v9 = vpop.f32.mrf.mxu0 }
 0x395   : > { %v1312_v19 = vpop.f32.mrf.mxu1  ;;  %v1431_v60 = vadd.f32 %v1307_v51, %v1293_v9 }
 0x396   : > { %v1328_v42 = vpop.f32.mrf.mxu2  ;;  %v1432_v49 = vadd.f32 %v1326_v3, %v1312_v19  ;;  %v424_v19 = vand.u32 127, %v363_v62 }
 0x397   : > { %v1347_v36 = vpop.f32.mrf.mxu3  ;;  %v3673_v40 = vadd.f32 %v3670_v38, %v1431_v60 }
 0x398   : > { %v3683_v17 = vadd.f32 %v3670_v38, %v1432_v49  ;;  %vm480_vm7 = vcmp.lt.s32.totalorder %v424_v19, 16 }
 0x399   : > { %v1476_v53 = vmul.f32 %v3339_v14, %v3673_v40 }
 0x39a   : > { %v1477_v16 = vmul.f32 %v3347_v21, %v3683_v17 }
 0x39b   : > { %v1514_v2 = vmul.f32 %v1476_v53, %v1476_v53  ;;  %v1493_v56 = vadd.f32 %v1476_v53, %v1475_v46 }
 0x39c   : > { %v1295_v7 = vpop.f32.mrf.mxu0  ;;  %v1515_v51 = vmul.f32 %v1477_v16, %v1477_v16 }
 0x39d   : > { %v1314_v35 = vpop.f32.mrf.mxu1  ;;  %v1438_v61 = vadd.f32 %v1309_v28, %v1295_v7  ;;  %v1531_v22 = vadd.f32 %v1514_v2, %v1513_v24 }
 0x39e   : > { %v1331_v27 = vpop.f32.mrf.mxu2  ;;  %v1439_v34 = vadd.f32 %v1328_v42, %v1314_v35 }
 0x39f   : > { %v1433_v8 = vadd.f32 %v1345_v54, %v1331_v27  ;;  %v3701_v52 = vadd.f32 %v3688_v44, %v1438_v61  ;;  %v1494_v54 = vadd.f32 %v1493_v56, %v1477_v16  ;;  %v1532_v42 = vadd.f32 %v1531_v22, %v1515_v51 }
 0x3a0   : > { %v1350_v10 = vpop.f32.mrf.mxu3 }
 0x3a1   : > { %v3686_v4 = vadd.f32 %v3670_v38, %v1433_v8  ;;  %v1485_v28 = vmul.f32 %v3339_v14, %v3701_v52  ;;  %v1522_v14 = vmul.f32 %v1484_v23, %v1484_v23 }
 0x3a3   : > { %v1478_v55 = vmul.f32 %v3361_v32, %v3686_v4 }
 0x3a4   : > { %v1364_v11 = vpop.f32.mrf.mxu0 }
 0x3a5   : > { %v1383_v45 = vpop.f32.mrf.mxu1  ;;  %v1434_v0 = vadd.f32 %v1364_v11, %v1350_v10  ;;  %v1516_v31 = vmul.f32 %v1478_v55, %v1478_v55  ;;  %v1495_v35 = vadd.f32 %v1494_v54, %v1478_v55  ;;  %v1503_v11 = vadd.f32 %v1485_v28, %v1484_v23 }
 0x3a6   : > { %v1333_v39 = vpop.f32.mrf.mxu2 }
 0x3a7   : > { %v3691_v50 = vadd.f32 %v3670_v38, %v1434_v0  ;;  %v1440_v5 = vadd.f32 %v1347_v36, %v1333_v39  ;;  %v3716_v36 = vadd.f32 %v3688_v44, %v1439_v34  ;;  %v1533_v10 = vadd.f32 %v1532_v42, %v1516_v31 }
 0x3a8   : > { %v1352_v47 = vpop.f32.mrf.mxu3 }
 0x3a9   : > { %v1479_v30 = vmul.f32 %v3381_v48, %v3691_v50  ;;  %v3719_v13 = vadd.f32 %v3688_v44, %v1440_v5  ;;  %v1486_v53 = vmul.f32 %v3347_v21, %v3716_v36 }
 0x3ab   : > { %v1517_v7 = vmul.f32 %v1479_v30, %v1479_v30  ;;  %v1496_v39 = vadd.f32 %v1495_v35, %v1479_v30  ;;  %v1487_v0 = vmul.f32 %v3361_v32, %v3719_v13  ;;  %v1504_v55 = vadd.f32 %v1503_v11, %v1486_v53 }
 0x3ac   : > { %v1366_v41 = vpop.f32.mrf.mxu0  ;;  %v1524_v30 = vmul.f32 %v1486_v53, %v1486_v53 }
 0x3ad   : > { %v1385_v58 = vpop.f32.mrf.mxu1  ;;  %v1441_v1 = vadd.f32 %v1366_v41, %v1352_v47  ;;  %v1523_v41 = vmul.f32 %v1485_v28, %v1485_v28 }
 0x3ae   : > { %v1402_v33 = vpop.f32.mrf.mxu2 }
 0x3af   : > { %v1541_v62 = vadd.f32 %v1523_v41, %v1522_v14 }
 0x3b0   : > { %v1421_v29 = vpop.f32.mrf.mxu3 }
 0x3b1   : > { %v1542_v28 = vadd.f32 %v1541_v62, %v1524_v30 }
 0x3b4   : > { %v1369_v20 = vpop.f32.mrf.mxu0 }
 0x3b5   : > { %v1435_v43 = vadd.f32 %v1383_v45, %v1369_v20  ;;  %v1388_v37 = vpop.f32.mrf.mxu1  ;;  %v3725_v45 = vadd.f32 %v3688_v44, %v1441_v1  ;;  %v2591_v20 = vsel %vm480_vm7, 1.0, %v3076_v12 }
 0x3b6   : > { %v1404_v26 = vpop.f32.mrf.mxu2  ;;  %v1436_v59 = vadd.f32 %v1402_v33, %v1388_v37  ;;  %v1534_v33 = vadd.f32 %v1533_v10, %v1517_v7 }
 0x3b7   : > { %v3709_v63 = vadd.f32 %v3670_v38, %v1435_v43 }
 0x3b8   : > { %v1423_v3 = vpop.f32.mrf.mxu3  ;;  %v3722_v27 = vadd.f32 %v3670_v38, %v1436_v59 }
 0x3b9   : > { %v1480_v9 = vmul.f32 %v3389_v57, %v3709_v63 }
 0x3ba   : > { %v1481_v2 = vmul.f32 %v3404_v15, %v3722_v27 }
 0x3bb   : > { %v1518_v47 = vmul.f32 %v1480_v9, %v1480_v9  ;;  %v1497_v61 = vadd.f32 %v1496_v39, %v1480_v9 }
 0x3bc   : > { %v1371_v60 = vpop.f32.mrf.mxu0  ;;  %v1519_v34 = vmul.f32 %v1481_v2, %v1481_v2 }
 0x3bd   : > { %v1442_v49 = vadd.f32 %v1385_v58, %v1371_v60  ;;  %v1390_v8 = vpop.f32.mrf.mxu1  ;;  %v1488_v58 = vmul.f32 %v3381_v48, %v3725_v45  ;;  %v1535_v37 = vadd.f32 %v1534_v33, %v1518_v47  ;;  %v1498_v5 = vadd.f32 %v1497_v61, %v1481_v2 }
 0x3be   : > { %v1407_v46 = vpop.f32.mrf.mxu2  ;;  %v1443_v56 = vadd.f32 %v1404_v26, %v1390_v8  ;;  %v1525_v26 = vmul.f32 %v1487_v0, %v1487_v0 }
 0x3bf   : > { %v1437_v24 = vadd.f32 %v1421_v29, %v1407_v46  ;;  %v3734_v16 = vadd.f32 %v3688_v44, %v1442_v49  ;;  %v1505_v29 = vadd.f32 %v1504_v55, %v1487_v0  ;;  %v1536_v31 = vadd.f32 %v1535_v37, %v1519_v34 }
 0x3c0   : > { %v1426_v21 = vpop.f32.mrf.mxu3  ;;  %v3751_v59 = vadd.f32 %v3688_v44, %v1443_v56  ;;  %v1526_v1 = vmul.f32 %v1488_v58, %v1488_v58  ;;  %v1543_v35 = vadd.f32 %v1542_v28, %v1525_v26  ;;  %v3079_v34 = vmov 2304.0  }
 0x3c1   : > { %v3740_v32 = vadd.f32 %v3670_v38, %v1437_v24  ;;  %v3743_v43 = vadd.f32 %v3670_v38, %v1426_v21  ;;  %v1489_v22 = vmul.f32 %v3389_v57, %v3734_v16  ;;  %v1506_v23 = vadd.f32 %v1505_v29, %v1488_v58 }
 0x3c2   : > { %v1490_v14 = vmul.f32 %v3404_v15, %v3751_v59  ;;  %v1544_v49 = vadd.f32 %v1543_v35, %v1526_v1  ;;  %2935 = vrcp.f32 %v3079_v34 }
 0x3c3   : > { %v1482_v48 = vmul.f32 %v3407_v18, %v3740_v32  ;;  %v1483_v12 = vmul.f32 %v2591_v20, %v3743_v43  ;;  %v1507_v54 = vadd.f32 %v1506_v23, %v1489_v22  ;;  %v1527_v11 = vmul.f32 %v1489_v22, %v1489_v22 }
 0x3c4   : > { %v1528_v0 = vmul.f32 %v1490_v14, %v1490_v14 }
 0x3c5   : > { %v1499_v38 = vadd.f32 %v1498_v5, %v1482_v48  ;;  %v1520_v51 = vmul.f32 %v1482_v48, %v1482_v48  ;;  %v1521_v42 = vmul.f32 %v1483_v12, %v1483_v12  ;;  %v1508_v8 = vadd.f32 %v1507_v54, %v1490_v14 }
 0x3c6   : > { %v1409_v57 = vpop.f32.mrf.mxu2  ;;  %v1545_v15 = vadd.f32 %v1544_v49, %v1527_v11 }
 0x3c7   : > { %v1444_v9 = vadd.f32 %v1423_v3, %v1409_v57  ;;  %v1500_v19 = vadd.f32 %v1499_v38, %v1483_v12  ;;  %v1537_v7 = vadd.f32 %v1536_v31, %v1520_v51 }
 0x3c8   : > { %v1428_v10 = vpop.f32.mrf.mxu3  ;;  %v1546_v61 = vadd.f32 %v1545_v15, %v1528_v0  ;;  %v2936_v48 = vpop.eup %2935  ;;  %v1596_v0 = vld [vmem:[%s4695_s7] sm:$0xff] }
 0x3c9   : > { %v3756_v60 = vadd.f32 %v3688_v44, %v1444_v9  ;;  %v3759_v39 = vadd.f32 %v3688_v44, %v1428_v10  ;;  %1501 = vadd.xlane.f32.xlu1 %v1500_v19  ;;  %v1538_v47 = vadd.f32 %v1537_v7, %v1521_v42  ;;  %v1564_v12 = vmul.f32 2304.0, %v2936_v48 }
 0x3ca   : > { %vm1568_vm14 = vweird.f32 %v2936_v48 }
 0x3cb   : > { %v1491_v3 = vmul.f32 %v3407_v18, %v3756_v60  ;;  %1539 = vadd.xlane.f32.xlu2 %v1538_v47  ;;  %v1492_v41 = vmul.f32 %v2591_v20, %v3759_v39  ;;  %v1565_v5 = vsub.f32 1.0, %v1564_v12 }
 0x3cd   : > { %v1509_v53 = vadd.f32 %v1508_v8, %v1491_v3  ;;  %v1529_v46 = vmul.f32 %v1491_v3, %v1491_v3  ;;  %v1530_v44 = vmul.f32 %v1492_v41, %v1492_v41  ;;  %v1566_v38 = vmul.f32 %v2936_v48, %v1565_v5 }
 0x3cf   : > { %v1510_v33 = vadd.f32 %v1509_v53, %v1492_v41  ;;  %v1547_v2 = vadd.f32 %v1546_v61, %v1529_v46  ;;  %v1567_v28 = vadd.f32 %v2936_v48, %v1566_v38 }
 0x3d1   : > { %1511 = vadd.xlane.f32.xlu0 %v1510_v33  ;;  %v1548_v24 = vadd.f32 %v1547_v2, %v1530_v44  ;;  %v1569_v42 = vsel %vm1568_vm14, %v2936_v48, %v1567_v28  ;;  %v1597_v33 = vld [vmem:[%s4695_s7 + $0x8] sm:$0xff] }
 0x3d9   : > { %1549 = vadd.xlane.f32.xlu0 %v1548_v24  ;;  %v1614_v24 = vld [vmem:[%s4696_s8] sm:$0xff] }
 0x43c   : > { %v1502_v55 = vpop.xlane.xlu1 %1501 }
 0x43d   : > { %v1551_v21 = vsel %vm4732_vm12, %v1502_v55, 0.0 }
 0x43e   : > { %v1540_v20 = vpop.xlane.xlu2 %1539 }
 0x43f   : > { %v1572_v62 = vsel %vm4734_vm13, %v1540_v20, 0.0 }
 0x444   : > { %v1512_v58 = vpop.xlane.xlu0 %1511 }
 0x445   : > { %v1552_v18 = vsel %vm4733_vm10, %v1512_v58, 0.0 }
 0x446   : > { %v1553_v56 = vadd.f32 %v1552_v18, %v1551_v21  ;;  %v1615_v18 = vld [vmem:[%s4696_s8 + $0x8] sm:$0xff] }
 0x448   : > { %1554 = vadd.xlane.f32.xlu0 %v1553_v56 }
 0x44c   : > { %v1550_v37 = vpop.xlane.xlu0 %1549 }
 0x44d   : > { %v1573_v29 = vsel %vm4735_vm9, %v1550_v37, 0.0 }
 0x44e   : > { %v1574_v22 = vadd.f32 %v1573_v29, %v1572_v62 }
 0x450   : > { %1575 = vadd.xlane.f32.xlu0 %v1574_v22 }
 0x4bb   : > { %v1555_v30 = vpop.xlane.xlu0 %1554 }
 0x4bc   : > { %v1556_v26 = vrot.slane %v1555_v30, 4 }
 0x4be   : > { %v1557_v23 = vadd.f32 %v1556_v26, %v1555_v30 }
 0x4c0   : > { %v1558_v51 = vrot.slane %v1557_v23, 2 }
 0x4c2   : > { %v1559_v31 = vadd.f32 %v1558_v51, %v1557_v23 }
 0x4c3   : > { %v1576_v1 = vpop.xlane.xlu0 %1575 }
 0x4c4   : > { %v1577_v54 = vrot.slane %v1576_v1, 4  ;;  %v1560_v57 = vrot.slane %v1559_v31, 1 }
 0x4c6   : > { %v1578_v9 = vadd.f32 %v1577_v54, %v1576_v1  ;;  %v1561_v19 = vadd.f32 %v1560_v57, %v1559_v31 }
 0x4c8   : > { %v1579_v7 = vrot.slane %v1578_v9, 2  ;;  %2832 = vpush %v1561_v19 }
 0x4c9   : > { %2834 = vpush %v1569_v42 }
 0x4ca   : > { %v1580_v35 = vadd.f32 %v1579_v7, %v1578_v9 }
 0x4cc   : > { %v1581_v14 = vrot.slane %v1580_v35, 1 }
 0x4ce   : > { %v1582_v10 = vadd.f32 %v1581_v14, %v1580_v35 }
 0x4d0   : > { %2836 = vpush %v1582_v10 }
 0x4f9   : > { %s2833_s14 = spop %2832 }
 0x4fa   : > { %s2835_s16 = spop %2834 }
 0x4fb   : > { %s3768_s17 = smul.f32 %s2835_s16, %s2833_s14  ;;  %s3025_s14 = scalar_lea.hbm %s4697_s9, 144 }
 0x4fd   : > { %s1593_s23 = smul.f32 %s3768_s17, %s3768_s17  ;;  %v1616_v44 = vstv %s3768_s17 }
 0x4fe   : > { %s2823_s17 = smul.u32 72, %s3208_s27 }
 0x501   : > { %s2837_s26 = spop %2836 }
 0x502   : > { %s1592_s22 = smul.f32 %s2837_s26, %s2835_s16  ;;  %s4205_s26 = scalar_lea.vmem [#allocation5], %s2823_s17 }
 0x503   : > { %s2502_s18 = sshll.u32 %s4205_s26, 4  ;;  %s2503_s18 = int_to_ptr.vmem [resolvable:$true] %s2502_s18 }
 0x504   : > { %s1594_s25 = ssub.f32 %s1592_s22, %s1593_s23  ;;  %s2840_s22 = smul.u32 72, %s3153_s13 }
 0x506   : > { %s1595_s24 = smax.f32 %s3078_s15, %s1594_s25 }
 0x507   : > { %s1598_s11 = sadd.f32 1e-05, %s1595_s24 }
 0x509   : > { %v1599_v11 = vstv %s1598_s11  ;;  %s2501_s11 = scalar_lea.hbm %s4697_s9, %s2840_s22 }
 0x50a   : > { %2937 = vrsqrt.f32 %v1599_v11  ;;  %vm1606_vm15 = vweird.f32 %v1599_v11  ;;  %s2504_s13 = sshll.u32 %s2501_s11, 4  ;;  %s2505_s13 = int_to_ptr.hbm [resolvable:$true] %s2504_s13 }
 0x50b   : > { %s3019_s15 = sshra.s32 %s2505_s13, 4  ;;  %s3020_s15 = int_to_ptr.hbm [resolvable:$true] %s3019_s15 }
 0x50c   : > { %s3021_s21 = scalar_lea.hbm %s3020_s15, 72  ;;  %p3026_p3 = scmp.lt.s32.totalorder %s3020_s15, %s4697_s9 }
 0x50d   : > { %p3022_p6 = scmp.ne.s32.totalorder %s3020_s15, %s3021_s21  ;;  %p3027_p4 = scmp.lt.s32.totalorder %s3025_s14, %s3021_s21 }
 0x50f   : > { %p3023_p13 = pnand %p3022_p6, %p3178_p11  ;;  %p3028_p5 = por %p3027_p4, %p3026_p3 }
 0x510   : > { %v2938_v47 = vpop.eup %2937 }
 0x511   : > { %v1601_v49 = vmul.f32 %v2938_v47, %v1599_v11  ;;  %vm1607_vm0 = vweird.f32 %v2938_v47  ;;  %p3024_p2 = pneg %p3023_p13 }
 0x512   : > { %vm1608_vm1 = vmor %vm1606_vm15, %vm1607_vm0 }
 0x513   : > { %v1602_v3 = vmul.f32 %v2938_v47, %v1601_v49  ;;  %p3029_p7 = pnand %p3028_p5, %p3024_p2 }
 0x515   : > { %v1603_v8 = vmul.f32 0.5, %v1602_v3 }
 0x517   : > { %v1604_v41 = vsub.f32 1.5, %v1603_v8 }
 0x519   : > { %v1605_v53 = vmul.f32 %v2938_v47, %v1604_v41 }
 0x51b   : > { %v1609_v15 = vsel %vm1608_vm1, %v2938_v47, %v1605_v53 }
 0x51c   : > { %2838 = vpush %v1609_v15 }
 0x54d   : > { %s2839_s28 = spop %2838 }
 0x54e   : > { %v1611_v46 = vstv %s2839_s28 }
 0x54f   : > { %v1612_v61 = vmul.f32 %v1611_v46, %v1596_v0  ;;  %v1613_v2 = vmul.f32 %v1611_v46, %v1597_v33 }
 0x551   : > { %v1617_v55 = vmul.f32 %v1616_v44, %v1612_v61  ;;  %1628 = vperm.xlu1 %2898, %v1613_v2   ;;  %1623 = vperm.xlu0 %2896, %v1612_v61   ;;  %v1618_v58 = vmul.f32 %v1616_v44, %v1613_v2 }
 0x553   : > { %v1619_v21 = vsub.f32 %v1614_v24, %v1617_v55  ;;  %v1620_v56 = vsub.f32 %v1615_v18, %v1618_v58 }
 0x555   : > { %1651 = vperm.xlu2 %2897, %v1619_v21  }
 0x559   : > { %1656 = vperm.xlu0 %2896, %v1620_v56  }
 0x5af   : > { %v3790_v34 = vpop.permute.xlu2 %1651 }
 0x5c3   : > { %v1624_v20 = vpop.permute.xlu0 %1623 }
 0x5c4   : > { %v1631_v37 = vmul.f32 %v1624_v20, %v3676_v25  ;;  %v1632_v62 = vmul.f32 %v1624_v20, %v3673_v40  ;;  %v1633_v29 = vmul.f32 %v1624_v20, %v3683_v17  ;;  %v1634_v22 = vmul.f32 %v1624_v20, %v3686_v4  ;;  %v3813_v4 = vpop.permute.xlu1 %1628 }
 0x5c5   : > { %v3828_v28 = vmul.f32 %v3813_v4, %v3694_v6  ;;  %v3832_v1 = vmul.f32 %v3813_v4, %v3701_v52  ;;  %v3836_v54 = vmul.f32 %v3813_v4, %v3716_v36  ;;  %v3842_v9 = vmul.f32 %v3813_v4, %v3719_v13 }
 0x5c6   : > { %v3793_v48 = vadd.f32 %v3790_v34, %v1631_v37  ;;  %v3796_v12 = vadd.f32 %v3790_v34, %v1632_v62  ;;  %v3799_v5 = vadd.f32 %v3790_v34, %v1633_v29  ;;  %v3802_v30 = vadd.f32 %v3790_v34, %v1634_v22 }
 0x5c7   : > { %v1635_v19 = vmul.f32 %v1624_v20, %v3691_v50  ;;  %v1636_v7 = vmul.f32 %v1624_v20, %v3709_v63  ;;  %v1637_v14 = vmul.f32 %v1624_v20, %v3722_v27  ;;  %v1638_v11 = vmul.f32 %v1624_v20, %v3740_v32 }
 0x5c8   : > { %v3805_v40 = vmul.f32 0.70710677, %v3793_v48  ;;  %v3808_v25 = vmul.f32 0.70710677, %v3796_v12  ;;  %v3811_v17 = vmul.f32 0.70710677, %v3799_v5  ;;  %v1639_v3 = vmul.f32 %v1624_v20, %v3743_v43 }
 0x5c9   : > { %v3816_v26 = vmul.f32 0.70710677, %v3802_v30  ;;  %v1663_v58 = vadd.f32 %v3790_v34, %v1635_v19 }
 0x5ca   : > { %v1713_v23 = vmul.f32 %v3805_v40, %v3805_v40  ;;  %v1753_v38 = vmul.f32 %v3808_v25, %v3808_v25  ;;  %v1793_v51 = vmul.f32 %v3811_v17, %v3811_v17 }
 0x5cb   : > { %v1833_v31 = vmul.f32 %v3816_v26, %v3816_v26 }
 0x5cc   : > { %v3838_v57 = vmin.f32 %v1713_v23, 16.0  ;;  %v3845_v42 = vmin.f32 %v1753_v38, 16.0  ;;  %v3847_v6 = vmin.f32 %v1793_v51, 16.0 }
 0x5cd   : > { %v3852_v36 = vmin.f32 %v1833_v31, 16.0 }
 0x5ce   : > { %v1715_v52 = vmul.f32 2.1237322e-06, %v3838_v57  ;;  %v1726_v35 = vmul.f32 3.8918573e-05, %v3838_v57  ;;  %v1755_v10 = vmul.f32 2.1237322e-06, %v3845_v42 }
 0x5cf   : > { %v1766_v13 = vmul.f32 3.8918573e-05, %v3845_v42  ;;  %v1795_v50 = vmul.f32 2.1237322e-06, %v3847_v6  ;;  %v1806_v63 = vmul.f32 3.8918573e-05, %v3847_v6 }
 0x5d0   : > { %v1716_v47 = vadd.f32 0.00028619796, %v1715_v52  ;;  %v1727_v49 = vadd.f32 0.001143296, %v1726_v35  ;;  %v1756_v8 = vadd.f32 0.00028619796, %v1755_v10 }
 0x5d1   : > { %v1767_v41 = vadd.f32 0.001143296, %v1766_v13  ;;  %v1796_v53 = vadd.f32 0.00028619796, %v1795_v50  ;;  %v1807_v0 = vadd.f32 0.001143296, %v1806_v63 }
 0x5d2   : > { %v1717_v15 = vmul.f32 %v1716_v47, %v3838_v57  ;;  %v1728_v27 = vmul.f32 %v1727_v49, %v3838_v57  ;;  %v1835_v33 = vmul.f32 2.1237322e-06, %v3852_v36  ;;  %v1757_v46 = vmul.f32 %v1756_v8, %v3845_v42 }
 0x5d3   : > { %v1768_v32 = vmul.f32 %v1767_v41, %v3845_v42  ;;  %v1797_v61 = vmul.f32 %v1796_v53, %v3847_v6  ;;  %v1846_v2 = vmul.f32 3.8918573e-05, %v3852_v36  ;;  %v1808_v24 = vmul.f32 %v1807_v0, %v3847_v6 }
 0x5d4   : > { %v1718_v44 = vadd.f32 0.0036580483, %v1717_v15  ;;  %v1729_v43 = vadd.f32 0.014752088, %v1728_v27  ;;  %v1836_v55 = vadd.f32 0.00028619796, %v1835_v33  ;;  %v1664_v53 = vadd.f32 %v3790_v34, %v1636_v7 }
 0x5d5   : > { %v1758_v21 = vadd.f32 0.0036580483, %v1757_v46  ;;  %v1769_v18 = vadd.f32 0.014752088, %v1768_v32  ;;  %v1798_v56 = vadd.f32 0.0036580483, %v1797_v61  ;;  %v3884_v15 = vadd.f32 %v3790_v34, %v1637_v14 }
 0x5d6   : > { %v1719_v20 = vmul.f32 %v1718_v44, %v3838_v57  ;;  %v1730_v37 = vmul.f32 %v1729_v43, %v3838_v57  ;;  %v1809_v62 = vadd.f32 0.014752088, %v1808_v24  ;;  %v1837_v29 = vmul.f32 %v1836_v55, %v3852_v36 }
 0x5d7   : > { %v1759_v22 = vmul.f32 %v1758_v21, %v3845_v42  ;;  %v1770_v23 = vmul.f32 %v1769_v18, %v3845_v42  ;;  %v1799_v38 = vmul.f32 %v1798_v56, %v3847_v6  ;;  %v1847_v51 = vadd.f32 0.001143296, %v1846_v2 }
 0x5d8   : > { %v1720_v31 = vadd.f32 0.05243302, %v1719_v20  ;;  %v1731_v52 = vadd.f32 0.112945676, %v1730_v37  ;;  %v1810_v19 = vmul.f32 %v1809_v62, %v3847_v6  ;;  %v1838_v35 = vadd.f32 0.0036580483, %v1837_v29 }
 0x5d9   : > { %v1760_v10 = vadd.f32 0.05243302, %v1759_v22  ;;  %v1771_v13 = vadd.f32 0.112945676, %v1770_v23  ;;  %v1800_v50 = vadd.f32 0.05243302, %v1799_v38  ;;  %v1848_v47 = vmul.f32 %v1847_v51, %v3852_v36 }
 0x5da   : > { %v3878_v49 = vmul.f32 0.70710677, %v1663_v58  ;;  %v1721_v63 = vmul.f32 %v1720_v31, %v3838_v57  ;;  %v1732_v8 = vmul.f32 %v1731_v52, %v3838_v57  ;;  %v1811_v41 = vadd.f32 0.112945676, %v1810_v19 }
 0x5db   : > { %v1772_v27 = vmul.f32 %v1771_v13, %v3845_v42  ;;  %v1849_v0 = vadd.f32 0.014752088, %v1848_v47  ;;  %v1761_v46 = vmul.f32 %v1760_v10, %v3845_v42  ;;  %v1839_v61 = vmul.f32 %v1838_v35, %v3852_v36 }
 0x5dc   : > { %v1733_v33 = vadd.f32 0.4994258, %v1732_v8  ;;  %v1812_v32 = vmul.f32 %v1811_v41, %v3847_v6  ;;  %v3891_v2 = vadd.f32 %v3790_v34, %v1638_v11  ;;  %v1801_v43 = vmul.f32 %v1800_v50, %v3847_v6 }
 0x5dd   : > { %v1773_v44 = vadd.f32 0.4994258, %v1772_v27  ;;  %v1850_v7 = vmul.f32 %v1849_v0, %v3852_v36  ;;  %v1722_v14 = vadd.f32 0.18741608, %v1721_v63  ;;  %v1873_v21 = vmul.f32 %v3878_v49, %v3878_v49 }
 0x5de   : > { %v1734_v24 = vmul.f32 %v1733_v33, %v3838_v57  ;;  %v1813_v55 = vadd.f32 0.4994258, %v1812_v32  ;;  %v3899_v18 = vadd.f32 %v3790_v34, %v1639_v3  ;;  %v3901_v56 = vmul.f32 0.70710677, %v1664_v53 }
 0x5df   : > { %v1774_v11 = vmul.f32 %v1773_v44, %v3845_v42  ;;  %v1851_v20 = vadd.f32 0.112945676, %v1850_v7  ;;  %v3905_v37 = vmul.f32 0.5, %v3793_v48  ;;  %v1762_v29 = vadd.f32 0.18741608, %v1761_v46 }
 0x5e0   : > { %v3907_v62 = vadd.f32 1.0, %v1734_v24  ;;  %v1840_v22 = vadd.f32 0.05243302, %v1839_v61  ;;  %v1802_v38 = vadd.f32 0.18741608, %v1801_v43  ;;  %v1814_v51 = vmul.f32 %v1813_v55, %v3847_v6 }
 0x5e1   : > { %v3909_v23 = vadd.f32 1.0, %v1774_v11  ;;  %v1852_v34 = vmul.f32 %v1851_v20, %v3852_v36  ;;  %v3914_v3 = vmul.f32 0.5, %v3796_v12  ;;  %v1723_v31 = vmul.f32 %v1722_v14, %v3838_v57 }
 0x5e2   : > { %2939 = vrcp.f32 %v3907_v62  ;;  %v3918_v48 = vmin.f32 %v1873_v21, 16.0  ;;  %v3921_v52 = vmul.f32 0.5, %v3799_v5  ;;  %v3924_v19 = vmul.f32 0.5, %v3802_v30 }
 0x5e3   : > { %2941 = vrcp.f32 %v3909_v23  ;;  %v1913_v35 = vmul.f32 %v3901_v56, %v3901_v56  ;;  %v3929_v10 = vmul.f32 0.5, %v1663_v58  ;;  %v3931_v12 = vmul.f32 0.5, %v1664_v53 }
 0x5e4   : > { %v3934_v57 = vmul.f32 0.70710677, %v3884_v15  ;;  %v1841_v13 = vmul.f32 %v1840_v22, %v3852_v36  ;;  %v1763_v5 = vmul.f32 %v1762_v29, %v3845_v42  ;;  %v1803_v50 = vmul.f32 %v1802_v38, %v3847_v6 }
 0x5e5   : > { %v3939_v30 = vadd.f32 1.0, %v1814_v51  ;;  %v1853_v47 = vadd.f32 0.4994258, %v1852_v34  ;;  %v3943_v63 = vmul.f32 %v3813_v4, %v3725_v45  ;;  %v1724_v58 = vadd.f32 1.1283791, %v1723_v31 }
 0x5e6   : > { %v1875_v8 = vmul.f32 2.1237322e-06, %v3918_v48  ;;  %v1886_v41 = vmul.f32 3.8918573e-05, %v3918_v48  ;;  %v3948_v53 = vmul.f32 0.70710677, %v3891_v2  ;;  %v1953_v46 = vmul.f32 %v3934_v57, %v3934_v57 }
 0x5e7   : > { %v3951_v27 = vmul.f32 0.70710677, %v3899_v18  ;;  %2943 = vrcp.f32 %v3939_v30  ;;  %v3954_v42 = vmin.f32 %v1913_v35, 16.0  ;;  %v1854_v45 = vmul.f32 %v1853_v47, %v3852_v36 }
 0x5e8   : > { %v3956_v6 = vpop.eup %2939  ;;  %v1876_v0 = vadd.f32 0.00028619796, %v1875_v8  ;;  %v1887_v33 = vadd.f32 0.001143296, %v1886_v41  ;;  %v1764_v44 = vadd.f32 1.1283791, %v1763_v5  ;;  %v3966_v14 = vmul.f32 %v1724_v58, %v3805_v40 }
 0x5e9   : > { %v3961_v32 = vpop.eup %2941  ;;  %v1737_v61 = vmul.f32 %v3956_v6, %v3907_v62  ;;  %v1804_v43 = vadd.f32 1.1283791, %v1803_v50  ;;  %v1842_v7 = vadd.f32 0.18741608, %v1841_v13  ;;  %v1745_v24 = vand.u32 2147483647, %v3907_v62 }
 0x5ea   : > { %v1777_v55 = vmul.f32 %v3961_v32, %v3909_v23  ;;  %v3971_v21 = vadd.f32 1.0, %v1854_v45  ;;  %v1747_v20 = vand.u32 2147483648, %v3907_v62  ;;  %v1877_v29 = vmul.f32 %v1876_v0, %v3918_v48 }
 0x5eb   : > { %v1738_v11 = vsub.f32 1.0, %v1737_v61  ;;  %v1888_v22 = vmul.f32 %v1887_v33, %v3918_v48  ;;  %vm1741_vm2 = vweird.f32 %v3907_v62  ;;  %v1915_v40 = vmul.f32 2.1237322e-06, %v3954_v42 }
 0x5ec   : > { %v1778_v38 = vsub.f32 1.0, %v1777_v55  ;;  %2945 = vrcp.f32 %v3971_v21  ;;  %v3983_v31 = vmul.f32 %v1764_v44, %v3808_v25  ;;  %v1878_v35 = vadd.f32 0.0036580483, %v1877_v29 }
 0x5ed   : > { %v3979_v51 = vpop.eup %2943  ;;  %v1739_v34 = vmul.f32 %v3956_v6, %v1738_v11  ;;  %v1889_v13 = vadd.f32 0.014752088, %v1888_v22  ;;  %vm1781_vm3 = vweird.f32 %v3909_v23  ;;  %v1785_v5 = vand.u32 2147483647, %v3909_v23 }
 0x5ee   : > { %v1787_v50 = vand.u32 2147483648, %v3909_v23  ;;  %v3989_v47 = vmul.f32 %v1804_v43, %v3811_v17  ;;  %v1817_v58 = vmul.f32 %v3979_v51, %v3939_v30  ;;  %vm3993_vm4 = vcmp.eq.f32.partialorder %v1745_v24, 8.507059e+37 }
 0x5ef   : > { %v1748_v25 = vor.u32 1.1754944e-38, %v1747_v20  ;;  %v1843_v41 = vmul.f32 %v1842_v7, %v3852_v36  ;;  %v1879_v45 = vmul.f32 %v1878_v35, %v3918_v48  ;;  %v1890_v0 = vmul.f32 %v1889_v13, %v3918_v48 }
 0x5f0   : > { %vm1742_vm5 = vweird.f32 %v3956_v6  ;;  %v1779_v33 = vmul.f32 %v3961_v32, %v1778_v38  ;;  %v1818_v17 = vsub.f32 1.0, %v1817_v58  ;;  %v1916_v61 = vadd.f32 0.00028619796, %v1915_v40 }
 0x5f1   : > { %v1740_v44 = vadd.f32 %v3956_v6, %v1739_v34  ;;  %v1880_v43 = vadd.f32 0.05243302, %v1879_v45  ;;  %v1891_v24 = vadd.f32 0.112945676, %v1890_v0  ;;  %v1926_v55 = vmul.f32 3.8918573e-05, %v3954_v42  ;;  %vm4021_vm11 = vmor %vm1741_vm2, %vm1742_vm5 }
 0x5f2   : > { %v4004_v11 = vpop.eup %2945  ;;  %v1788_v20 = vor.u32 1.1754944e-38, %v1787_v50  ;;  %v1819_v36 = vmul.f32 %v3979_v51, %v1818_v17  ;;  %v1825_v7 = vand.u32 2147483647, %v3939_v30  ;;  %v1917_v29 = vmul.f32 %v1916_v61, %v3954_v42 }
 0x5f3   : > { %vm4009_vm6 = vcmp.eq.f32.partialorder %v1785_v5, 8.507059e+37  ;;  %vm1821_vm8 = vweird.f32 %v3939_v30  ;;  %v1827_v38 = vand.u32 2147483648, %v3939_v30  ;;  %v1844_v40 = vadd.f32 1.1283791, %v1843_v41 }
 0x5f4   : > { %v1857_v34 = vmul.f32 %v4004_v11, %v3971_v21  ;;  %v1780_v13 = vadd.f32 %v3961_v32, %v1779_v33  ;;  %vm1782_vm7 = vweird.f32 %v3961_v32  ;;  %v1892_v5 = vmul.f32 %v1891_v24, %v3918_v48 }
 0x5f5   : > { %v4028_v50 = vmin.f32 %v1953_v46, 16.0  ;;  %v1744_v58 = vsel %vm4021_vm11, %v3956_v6, %v1740_v44  ;;  %v1881_v41 = vmul.f32 %v1880_v43, %v3918_v48  ;;  %v1918_v45 = vadd.f32 0.0036580483, %v1917_v29  ;;  %vm4042_vm13 = vmor %vm1781_vm3, %vm1782_vm7 }
 0x5f6   : > { %v1927_v62 = vadd.f32 0.001143296, %v1926_v55  ;;  %v1820_v0 = vadd.f32 %v3979_v51, %v1819_v36  ;;  %vm1822_vm12 = vweird.f32 %v3979_v51  ;;  %vm4036_vm10 = vcmp.eq.f32.partialorder %v1825_v7, 8.507059e+37 }
 0x5f7   : > { %v1893_v17 = vadd.f32 0.4994258, %v1892_v5  ;;  %v1828_v6 = vor.u32 1.1754944e-38, %v1827_v38  ;;  %v1858_v61 = vsub.f32 1.0, %v1857_v34  ;;  %v1867_v44 = vand.u32 2147483648, %v3971_v21  ;;  %vm4057_vm9 = vmor %vm1821_vm8, %vm1822_vm12 }
 0x5f8   : > { %v1928_v43 = vmul.f32 %v1927_v62, %v3954_v42  ;;  %v1749_v24 = vsel %vm3993_vm4, %v1748_v25, %v1744_v58  ;;  %v1784_v55 = vsel %vm4042_vm13, %v3961_v32, %v1780_v13  ;;  %v1955_v23 = vmul.f32 2.1237322e-06, %v4028_v50 }
 0x5f9   : > { %v1894_v36 = vmul.f32 %v1893_v17, %v3918_v48  ;;  %v1882_v29 = vadd.f32 0.18741608, %v1881_v41  ;;  %v1919_v38 = vmul.f32 %v1918_v45, %v3954_v42  ;;  %v1966_v8 = vmul.f32 3.8918573e-05, %v4028_v50 }
 0x5fa   : > { %v1929_v34 = vadd.f32 0.014752088, %v1928_v43  ;;  %v1824_v32 = vsel %vm4057_vm9, %v3979_v51, %v1820_v0  ;;  %v1865_v25 = vand.u32 2147483647, %v3971_v21  ;;  %v1956_v13 = vadd.f32 0.00028619796, %v1955_v23 }
 0x5fb   : > { %v4067_v35 = vadd.f32 1.0, %v1894_v36  ;;  %v4070_v30 = vmul.f32 %v1749_v24, %v3966_v14  ;;  %v1859_v5 = vmul.f32 %v4004_v11, %v1858_v61  ;;  %v1967_v41 = vadd.f32 0.001143296, %v1966_v8 }
 0x5fc   : > { %v1930_v58 = vmul.f32 %v1929_v34, %v3954_v42  ;;  %v1789_v45 = vsel %vm4009_vm6, %v1788_v20, %v1784_v55  ;;  %v4077_v62 = vmul.f32 %v1844_v40, %v3816_v26  ;;  %vm1861_vm14 = vweird.f32 %v3971_v21 }
 0x5fd   : > { %2947 = vrcp.f32 %v4067_v35  ;;  %v1829_v51 = vsel %vm4036_vm10, %v1828_v6, %v1824_v32  ;;  %v1868_v14 = vor.u32 1.1754944e-38, %v1867_v44  ;;  %v1883_v0 = vmul.f32 %v1882_v29, %v3918_v48 }
 0x5fe   : > { %v1920_v17 = vadd.f32 0.05243302, %v1919_v38  ;;  %v1931_v46 = vadd.f32 0.112945676, %v1930_v58  ;;  %v1957_v61 = vmul.f32 %v1956_v13, %v4028_v50  ;;  %v1968_v22 = vmul.f32 %v1967_v41, %v4028_v50 }
 0x5ff   : > { %v1993_v26 = vmul.f32 %v3948_v53, %v3948_v53  ;;  %v2764_v20 = vclamps-f32 %v4070_v30, 1.0  ;;  %v4090_v40 = vmul.f32 %v1789_v45, %v3983_v31  ;;  %v1860_v33 = vadd.f32 %v4004_v11, %v1859_v5 }
 0x600   : > { %vm1862_vm0 = vweird.f32 %v4004_v11  ;;  %vm4094_vm15 = vcmp.eq.f32.partialorder %v1865_v25, 8.507059e+37  ;;  %v1932_v6 = vmul.f32 %v1931_v46, %v3954_v42  ;;  %v1958_v44 = vadd.f32 0.0036580483, %v1957_v61 }
 0x601   : > { %v1969_v43 = vadd.f32 0.014752088, %v1968_v22  ;;  %v4099_v24 = vmin.f32 %v1993_v26, 16.0  ;;  %v4102_v55 = vmul.f32 %v1829_v51, %v3989_v47  ;;  %v1884_v36 = vadd.f32 1.1283791, %v1883_v0  ;;  %vm4109_vm1 = vmor %vm1861_vm14, %vm1862_vm0 }
 0x602   : > { %v1921_v31 = vmul.f32 %v1920_v17, %v3954_v42  ;;  %v2033_v23 = vmul.f32 %v3951_v27, %v3951_v27  ;;  %v1933_v38 = vadd.f32 0.4994258, %v1932_v6  ;;  %v1959_v34 = vmul.f32 %v1958_v44, %v4028_v50 }
 0x603   : > { %v2948_v7 = vpop.eup %2947  ;;  %v1970_v8 = vmul.f32 %v1969_v43, %v4028_v50  ;;  %v1995_v47 = vmul.f32 2.1237322e-06, %v4099_v24  ;;  %v1864_v32 = vsel %vm4109_vm1, %v4004_v11, %v1860_v33  ;;  %v1905_v13 = vand.u32 2147483647, %v4067_v35 }
 0x604   : > { %v1897_v25 = vmul.f32 %v2948_v7, %v4067_v35  ;;  %v2006_v21 = vmul.f32 3.8918573e-05, %v4099_v24  ;;  %v1934_v5 = vmul.f32 %v1933_v38, %v3954_v42  ;;  %v1960_v58 = vadd.f32 0.05243302, %v1959_v34 }
 0x605   : > { %v1971_v41 = vadd.f32 0.112945676, %v1970_v8  ;;  %v1996_v45 = vadd.f32 0.00028619796, %v1995_v47  ;;  %v1907_v0 = vand.u32 2147483648, %v4067_v35  ;;  %v4124_v46 = vmin.f32 %v2033_v23, 16.0 }
 0x606   : > { %v1898_v51 = vsub.f32 1.0, %v1897_v25  ;;  %v2007_v17 = vadd.f32 0.001143296, %v2006_v21  ;;  %v1922_v61 = vadd.f32 0.18741608, %v1921_v31  ;;  %v4126_v22 = vadd.f32 1.0, %v1934_v5 }
 0x607   : > { %v1972_v11 = vmul.f32 %v1971_v41, %v4028_v50  ;;  %v1997_v26 = vmul.f32 %v1996_v45, %v4099_v24  ;;  %vm1902_vm2 = vweird.f32 %v2948_v7  ;;  %v2035_v44 = vmul.f32 2.1237322e-06, %v4124_v46 }
 0x608   : > { %v1899_v33 = vmul.f32 %v2948_v7, %v1898_v51  ;;  %v2008_v6 = vmul.f32 %v2007_v17, %v4099_v24  ;;  %v1869_v43 = vsel %vm4094_vm15, %v1868_v14, %v1864_v32  ;;  %2949 = vrcp.f32 %v4126_v22 }
 0x609   : > { %v1961_v23 = vmul.f32 %v1960_v58, %v4028_v50  ;;  %v2046_v31 = vmul.f32 3.8918573e-05, %v4124_v46  ;;  %vm1901_vm3 = vweird.f32 %v4067_v35  ;;  %v1973_v38 = vadd.f32 0.4994258, %v1972_v11 }
 0x60a   : > { %v1900_v29 = vadd.f32 %v2948_v7, %v1899_v33  ;;  %v1998_v34 = vadd.f32 0.0036580483, %v1997_v26  ;;  %v1885_v8 = vmul.f32 %v1884_v36, %v3878_v49  ;;  %vm1903_vm4 = vmor %vm1901_vm3, %vm1902_vm2  ;;  %v1923_v47 = vmul.f32 %v1922_v61, %v3954_v42 }
 0x60b   : > { %v2009_v25 = vadd.f32 0.014752088, %v2008_v6  ;;  %v2036_v21 = vadd.f32 0.00028619796, %v2035_v44  ;;  %vm1906_vm5 = vcmp.eq.f32.partialorder %v1905_v13, 8.507059e+37  ;;  %v1908_v14 = vor.u32 1.1754944e-38, %v1907_v0 }
 0x60c   : > { %v1904_v48 = vsel %vm1903_vm4, %v2948_v7, %v1900_v29  ;;  %v1974_v32 = vmul.f32 %v1973_v38, %v4028_v50  ;;  %v1962_v5 = vadd.f32 0.18741608, %v1961_v23  ;;  %v2047_v35 = vadd.f32 0.001143296, %v2046_v31 }
 0x60d   : > { %v2010_v58 = vmul.f32 %v2009_v25, %v4099_v24  ;;  %v2037_v41 = vmul.f32 %v2036_v21, %v4124_v46  ;;  %v1870_v45 = vmul.f32 %v1869_v43, %v4077_v62  ;;  %v1909_v51 = vsel %vm1906_vm5, %v1908_v14, %v1904_v48 }
 0x60e   : > { %v4144_v49 = vadd.f32 1.0, %v1974_v32  ;;  %v1999_v42 = vmul.f32 %v1998_v34, %v4099_v24  ;;  %v2950_v36 = vpop.eup %2949  ;;  %v1924_v17 = vadd.f32 1.1283791, %v1923_v47  ;;  %v2048_v0 = vmul.f32 %v2047_v35, %v4124_v46 }
 0x60f   : > { %v2011_v7 = vadd.f32 0.112945676, %v2010_v58  ;;  %v2038_v13 = vadd.f32 0.0036580483, %v2037_v41  ;;  %v2765_v61 = vclamps-f32 %v4090_v40, 1.0  ;;  %v2766_v11 = vclamps-f32 %v4102_v55, 1.0 }
 0x610   : > { %v1937_v26 = vmul.f32 %v2950_v36, %v4126_v22  ;;  %v1945_v33 = vand.u32 2147483647, %v4126_v22  ;;  %v1910_v62 = vmul.f32 %v1909_v51, %v1885_v8  ;;  %v1947_v6 = vand.u32 2147483648, %v4126_v22 }
 0x611   : > { %v1963_v44 = vmul.f32 %v1962_v5, %v4028_v50  ;;  %2951 = vrcp.f32 %v4144_v49  ;;  %v2000_v23 = vadd.f32 0.05243302, %v1999_v42  ;;  %v2012_v31 = vmul.f32 %v2011_v7, %v4099_v24 }
 0x612   : > { %v1938_v43 = vsub.f32 1.0, %v1937_v26  ;;  %v2039_v29 = vmul.f32 %v2038_v13, %v4124_v46  ;;  %v2767_v40 = vclamps-f32 %v1870_v45, 1.0  ;;  %v1925_v55 = vmul.f32 %v1924_v17, %v3901_v56 }
 0x613   : > { %vm1941_vm6 = vweird.f32 %v4126_v22  ;;  %v2049_v38 = vadd.f32 0.014752088, %v2048_v0  ;;  %vm1942_vm8 = vweird.f32 %v2950_v36  ;;  %vm4159_vm11 = vcmp.eq.f32.partialorder %v1945_v33, 8.507059e+37 }
 0x614   : > { %v1939_v34 = vmul.f32 %v2950_v36, %v1938_v43  ;;  %v2013_v50 = vadd.f32 0.4994258, %v2012_v31  ;;  %v2768_v47 = vclamps-f32 %v1910_v62, 1.0  ;;  %v1948_v25 = vor.u32 1.1754944e-38, %v1947_v6  ;;  %vm1943_vm7 = vmor %vm1941_vm6, %vm1942_vm8 }
 0x615   : > { %v1964_v21 = vadd.f32 1.1283791, %v1963_v44  ;;  %v2050_v48 = vmul.f32 %v2049_v38, %v4124_v46  ;;  %v2001_v32 = vmul.f32 %v2000_v23, %v4099_v24  ;;  %v2040_v5 = vadd.f32 0.05243302, %v2039_v29 }
 0x616   : > { %v1940_v14 = vadd.f32 %v2950_v36, %v1939_v34  ;;  %v2014_v56 = vmul.f32 %v2013_v50, %v4099_v24  ;;  %v1985_v41 = vand.u32 2147483647, %v4144_v49  ;;  %v2433_v45 = vadd.f32 1.0, %v2764_v20 }
 0x617   : > { %v2952_v58 = vpop.eup %2951  ;;  %v2051_v35 = vadd.f32 0.112945676, %v2050_v48  ;;  %v2434_v51 = vadd.f32 1.0, %v2765_v61  ;;  %v1987_v7 = vand.u32 2147483648, %v4144_v49  ;;  %v2435_v13 = vadd.f32 1.0, %v2766_v11 }
 0x618   : > { %v1944_v42 = vsel %vm1943_vm7, %v2950_v36, %v1940_v14  ;;  %v1977_v17 = vmul.f32 %v2952_v58, %v4144_v49  ;;  %v4175_v26 = vadd.f32 1.0, %v2014_v56  ;;  %v2436_v33 = vadd.f32 1.0, %v2767_v40 }
 0x619   : > { %v1949_v0 = vsel %vm4159_vm11, %v1948_v25, %v1944_v42  ;;  %v2052_v22 = vmul.f32 %v2051_v35, %v4124_v46  ;;  %v2002_v30 = vadd.f32 0.18741608, %v2001_v32  ;;  %v2041_v20 = vmul.f32 %v2040_v5, %v4124_v46 }
 0x61a   : > { %v1950_v62 = vmul.f32 %v1949_v0, %v1925_v55  ;;  %v1978_v6 = vsub.f32 1.0, %v1977_v17  ;;  %2953 = vrcp.f32 %v4175_v26  ;;  %v2437_v36 = vadd.f32 1.0, %v2768_v47 }
 0x61b   : > { %v2451_v61 = vmul.f32 %v2433_v45, %v3905_v37  ;;  %v2452_v11 = vmul.f32 %v2434_v51, %v3914_v3  ;;  %vm1982_vm12 = vweird.f32 %v2952_v58  ;;  %v2053_v23 = vadd.f32 0.4994258, %v2052_v22 }
 0x61c   : > { %v2769_v44 = vclamps-f32 %v1950_v62, 1.0  ;;  %v1979_v43 = vmul.f32 %v2952_v58, %v1978_v6  ;;  %vm1981_vm10 = vweird.f32 %v4144_v49  ;;  %v1988_v31 = vor.u32 1.1754944e-38, %v1987_v7 }
 0x61d   : > { %v2453_v29 = vmul.f32 %v2435_v13, %v3921_v52  ;;  %v2454_v40 = vmul.f32 %v2436_v33, %v3924_v19  ;;  %v2042_v38 = vadd.f32 0.18741608, %v2041_v20  ;;  %v2054_v34 = vmul.f32 %v2053_v23, %v4124_v46  ;;  %vm1983_vm13 = vmor %vm1981_vm10, %vm1982_vm12  ;;  %v4192_v19 = vpop.permute.xlu0 %1656 }
 0x61e   : > { %v1980_v55 = vadd.f32 %v2952_v58, %v1979_v43  ;;  %v2438_v8 = vadd.f32 1.0, %v2769_v44  ;;  %v2003_v37 = vmul.f32 %v2002_v30, %v4099_v24  ;;  %v2455_v3 = vmul.f32 %v2437_v36, %v3929_v10 }
 0x61f   : > { %v2469_v50 = vpack.c.bf16 %v2452_v11, %v2451_v61  ;;  %v2470_v47 = vpack.c.bf16 %v2454_v40, %v2453_v29  ;;  %vm1986_vm9 = vcmp.eq.f32.partialorder %v1985_v41, 8.507059e+37  ;;  %v4189_v49 = vadd.f32 1.0, %v2054_v34 }
 0x620   : > { %v1984_v25 = vsel %vm1983_vm13, %v2952_v58, %v1980_v55  ;;  %v2456_v52 = vmul.f32 %v2438_v8, %v3931_v12  ;;  %v2954_v48 = vpop.eup %2953  ;;  %v4196_v14 = vmul.f32 %v3813_v4, %v3734_v16  ;;  %v4200_v24 = vmul.f32 %v3813_v4, %v3751_v59 }
 0x621   : > { %v1965_v10 = vmul.f32 %v1964_v21, %v3934_v57  ;;  %v1989_v32 = vsel %vm1986_vm9, %v1988_v31, %v1984_v25  ;;  %2479 = vst [vmem:[%s4205_s26] sm:$0xff] %v2469_v50  ;;  %v4210_v12 = vmul.f32 %v3813_v4, %v3756_v60  ;;  %v2017_v16 = vmul.f32 %v2954_v48, %v4175_v26 }
 0x622   : > { %v2043_v56 = vmul.f32 %v2042_v38, %v4124_v46  ;;  %2955 = vrcp.f32 %v4189_v49  ;;  %2480 = vst [vmem:[%s4205_s26 + $0x8] sm:$0xff] %v2470_v47  ;;  %v2004_v57 = vadd.f32 1.1283791, %v2003_v37  ;;  %v2471_v21 = vpack.c.bf16 %v2456_v52, %v2455_v3 }
 0x623   : > { %v1990_v59 = vmul.f32 %v1989_v32, %v1965_v10  ;;  %v4218_v5 = vadd.f32 %v4192_v19, %v3828_v28  ;;  %v2018_v58 = vsub.f32 1.0, %v2017_v16  ;;  %v2025_v41 = vand.u32 2147483647, %v4175_v26 }
 0x624   : > { %v4223_v60 = vadd.f32 %v4192_v19, %v3832_v1  ;;  %v4227_v46 = vadd.f32 %v4192_v19, %v3836_v54  ;;  %v4231_v35 = vmul.f32 %v3813_v4, %v3759_v39  ;;  %v1683_v45 = vmul.f32 0.5, %v3884_v15  ;;  %2481 = vst [vmem:[%s4205_s26 + $0x10] sm:$0xff] %v2471_v21 }
 0x625   : > { %v2027_v28 = vand.u32 2147483648, %v4175_v26  ;;  %v4238_v51 = vadd.f32 %v4192_v19, %v3842_v9  ;;  %v1684_v1 = vmul.f32 0.5, %v3891_v2  ;;  %v2019_v42 = vmul.f32 %v2954_v48, %v2018_v58 }
 0x626   : > { %vm2022_vm14 = vweird.f32 %v2954_v48  ;;  %v2044_v17 = vadd.f32 1.1283791, %v2043_v56  ;;  %v2770_v54 = vclamps-f32 %v1990_v59, 1.0  ;;  %v2005_v7 = vmul.f32 %v2004_v57, %v3948_v53 }
 0x627   : > { %vm2021_vm0 = vweird.f32 %v4175_v26  ;;  %v4244_v39 = vmul.f32 0.70710677, %v4218_v5  ;;  %v2020_v15 = vadd.f32 %v2954_v48, %v2019_v42  ;;  %vm2026_vm15 = vcmp.eq.f32.partialorder %v2025_v41, 8.507059e+37 }
 0x628   : > { %v2956_v4 = vpop.eup %2955  ;;  %v4247_v13 = vmul.f32 0.70710677, %v4223_v60  ;;  %v4250_v9 = vmul.f32 0.70710677, %v4227_v46  ;;  %vm2023_vm1 = vmor %vm2021_vm0, %vm2022_vm14  ;;  %v2028_v2 = vor.u32 1.1754944e-38, %v2027_v28  ;;  %v2045_v33 = vmul.f32 %v2044_v17, %v3951_v27 }
 0x629   : > { %v2057_v0 = vmul.f32 %v2956_v4, %v4189_v49  ;;  %v2065_v53 = vand.u32 2147483647, %v4189_v49  ;;  %v4255_v26 = vmul.f32 0.70710677, %v4238_v51  ;;  %v2024_v22 = vsel %vm2023_vm1, %v2954_v48, %v2020_v15 }
 0x62a   : > { %vm2061_vm2 = vweird.f32 %v4189_v49  ;;  %v2067_v62 = vand.u32 2147483648, %v4189_v49  ;;  %v2029_v6 = vsel %vm2026_vm15, %v2028_v2, %v2024_v22  ;;  %v2439_v20 = vadd.f32 1.0, %v2770_v54 }
 0x62b   : > { %v2058_v30 = vsub.f32 1.0, %v2057_v0  ;;  %v2073_v36 = vmul.f32 %v4244_v39, %v4244_v39  ;;  %v2030_v61 = vmul.f32 %v2029_v6, %v2005_v7  ;;  %v2113_v11 = vmul.f32 %v4247_v13, %v4247_v13 }
 0x62c   : > { %v2153_v44 = vmul.f32 %v4250_v9, %v4250_v9  ;;  %v2193_v27 = vmul.f32 %v4255_v26, %v4255_v26  ;;  %vm2062_vm3 = vweird.f32 %v2956_v4  ;;  %vm4268_vm4 = vcmp.eq.f32.partialorder %v2065_v53, 8.507059e+37 }
 0x62d   : > { %v2059_v43 = vmul.f32 %v2956_v4, %v2058_v30  ;;  %v4272_v31 = vmin.f32 %v2073_v36, 16.0  ;;  %v2771_v29 = vclamps-f32 %v2030_v61, 1.0  ;;  %v2068_v40 = vor.u32 1.1754944e-38, %v2067_v62  ;;  %vm2063_vm5 = vmor %vm2061_vm2, %vm2062_vm3 }
 0x62e   : > { %v4274_v55 = vmin.f32 %v2113_v11, 16.0  ;;  %v4276_v38 = vmin.f32 %v2153_v44, 16.0  ;;  %v2457_v8 = vmul.f32 %v2439_v20, %v1683_v45  ;;  %v4284_v52 = vmin.f32 %v2193_v27, 16.0 }
 0x62f   : > { %v2060_v34 = vadd.f32 %v2956_v4, %v2059_v43  ;;  %v2075_v37 = vmul.f32 2.1237322e-06, %v4272_v31  ;;  %v2086_v3 = vmul.f32 3.8918573e-05, %v4272_v31  ;;  %v2440_v50 = vadd.f32 1.0, %v2771_v29 }
 0x630   : > { %v2115_v47 = vmul.f32 2.1237322e-06, %v4274_v55  ;;  %v2126_v25 = vmul.f32 3.8918573e-05, %v4274_v55  ;;  %v2155_v16 = vmul.f32 2.1237322e-06, %v4276_v38  ;;  %v1672_v0 = vadd.f32 %v4192_v19, %v3943_v63 }
 0x631   : > { %v2064_v48 = vsel %vm2063_vm5, %v2956_v4, %v2060_v34  ;;  %v2076_v10 = vadd.f32 0.00028619796, %v2075_v37  ;;  %v2087_v32 = vadd.f32 0.001143296, %v2086_v3  ;;  %v2458_v59 = vmul.f32 %v2440_v50, %v1684_v1 }
 0x632   : > { %v2069_v56 = vsel %vm4268_vm4, %v2068_v40, %v2064_v48  ;;  %v2116_v57 = vadd.f32 0.00028619796, %v2115_v47  ;;  %v2127_v49 = vadd.f32 0.001143296, %v2126_v25  ;;  %v2156_v45 = vadd.f32 0.00028619796, %v2155_v16 }
 0x633   : > { %v2070_v21 = vmul.f32 %v2069_v56, %v2045_v33  ;;  %v2077_v58 = vmul.f32 %v2076_v10, %v4272_v31  ;;  %v2088_v41 = vmul.f32 %v2087_v32, %v4272_v31  ;;  %v2472_v28 = vpack.c.bf16 %v2458_v59, %v2457_v8 }
 0x634   : > { %v2117_v42 = vmul.f32 %v2116_v57, %v4274_v55  ;;  %v2128_v17 = vmul.f32 %v2127_v49, %v4274_v55  ;;  %v2166_v54 = vmul.f32 3.8918573e-05, %v4276_v38  ;;  %v2157_v1 = vmul.f32 %v2156_v45, %v4276_v38 }
 0x635   : > { %v2772_v7 = vclamps-f32 %v2070_v21, 1.0  ;;  %v2078_v4 = vadd.f32 0.0036580483, %v2077_v58  ;;  %v2089_v15 = vadd.f32 0.014752088, %v2088_v41  ;;  %v1685_v2 = vmul.f32 0.5, %v3899_v18 }
 0x636   : > { %2482 = vst [vmem:[%s4205_s26 + $0x18] sm:$0xff] %v2472_v28  ;;  %v2118_v53 = vadd.f32 0.0036580483, %v2117_v42  ;;  %v2129_v22 = vadd.f32 0.014752088, %v2128_v17  ;;  %v1673_v50 = vadd.f32 %v4192_v19, %v4196_v14  ;;  %v4314_v47 = vadd.f32 %v4192_v19, %v4200_v24 }
 0x637   : > { %v2441_v33 = vadd.f32 1.0, %v2772_v7  ;;  %v2079_v62 = vmul.f32 %v2078_v4, %v4272_v31  ;;  %v2090_v6 = vmul.f32 %v2089_v15, %v4272_v31  ;;  %v2158_v30 = vadd.f32 0.0036580483, %v2157_v1 }
 0x638   : > { %v2119_v20 = vmul.f32 %v2118_v53, %v4274_v55  ;;  %v2130_v36 = vmul.f32 %v2129_v22, %v4274_v55  ;;  %v2167_v61 = vadd.f32 0.001143296, %v2166_v54  ;;  %v2195_v11 = vmul.f32 2.1237322e-06, %v4284_v52 }
 0x639   : > { %v2459_v18 = vmul.f32 %v2441_v33, %v1685_v2  ;;  %v2080_v44 = vadd.f32 0.05243302, %v2079_v62  ;;  %v2091_v27 = vadd.f32 0.112945676, %v2090_v6  ;;  %v2159_v63 = vmul.f32 %v2158_v30, %v4276_v38 }
 0x63a   : > { %v2120_v43 = vadd.f32 0.05243302, %v2119_v20  ;;  %v2131_v23 = vadd.f32 0.112945676, %v2130_v36  ;;  %v2168_v29 = vmul.f32 %v2167_v61, %v4276_v38  ;;  %v2196_v40 = vadd.f32 0.00028619796, %v2195_v11 }
 0x63b   : > { %v2473_v34 = vpack.c.bf16 %v2459_v18, %v2459_v18  ;;  %v4306_v8 = vmul.f32 0.70710677, %v1672_v0  ;;  %v2081_v37 = vmul.f32 %v2080_v44, %v4272_v31  ;;  %v2092_v3 = vmul.f32 %v2091_v27, %v4272_v31 }
 0x63c   : > { %v2132_v25 = vmul.f32 %v2131_v23, %v4274_v55  ;;  %v2169_v48 = vadd.f32 0.014752088, %v2168_v29  ;;  %v4320_v10 = vadd.f32 %v4192_v19, %v4210_v12  ;;  %v2121_v16 = vmul.f32 %v2120_v43, %v4274_v55 }
 0x63d   : > { %2483 = vst [vmem:[%s4205_s26 + $0x20] sm:$0xf] %v2473_v34  ;;  %v2093_v32 = vadd.f32 0.4994258, %v2092_v3  ;;  %v2160_v56 = vadd.f32 0.05243302, %v2159_v63  ;;  %v4325_v59 = vadd.f32 %v4192_v19, %v4231_v35  ;;  %v2197_v57 = vmul.f32 %v2196_v40, %v4284_v52 }
 0x63e   : > { %v2133_v14 = vadd.f32 0.4994258, %v2132_v25  ;;  %v2170_v24 = vmul.f32 %v2169_v48, %v4276_v38  ;;  %v2082_v49 = vadd.f32 0.18741608, %v2081_v37  ;;  %v2206_v58 = vmul.f32 3.8918573e-05, %v4284_v52 }
 0x63f   : > { %v2094_v21 = vmul.f32 %v2093_v32, %v4272_v31  ;;  %v2233_v12 = vmul.f32 %v4306_v8, %v4306_v8  ;;  %v4334_v41 = vmul.f32 0.5, %v4218_v5  ;;  %v4336_v45 = vmul.f32 0.70710677, %v1673_v50 }
 0x640   : > { %v2134_v19 = vmul.f32 %v2133_v14, %v4274_v55  ;;  %v2171_v35 = vadd.f32 0.112945676, %v2170_v24  ;;  %v4340_v28 = vmul.f32 0.5, %v4223_v60  ;;  %v2122_v17 = vadd.f32 0.18741608, %v2121_v16 }
 0x641   : > { %v4342_v42 = vadd.f32 1.0, %v2094_v21  ;;  %v2161_v54 = vmul.f32 %v2160_v56, %v4276_v38  ;;  %v2198_v15 = vadd.f32 0.0036580483, %v2197_v57  ;;  %v2207_v5 = vadd.f32 0.001143296, %v2206_v58 }
 0x642   : > { %v4345_v7 = vadd.f32 1.0, %v2134_v19  ;;  %v2172_v4 = vmul.f32 %v2171_v35, %v4276_v38  ;;  %v4349_v1 = vmul.f32 0.5, %v4227_v46  ;;  %v2083_v2 = vmul.f32 %v2082_v49, %v4272_v31 }
 0x643   : > { %2957 = vrcp.f32 %v4342_v42  ;;  %v4353_v60 = vmin.f32 %v2233_v12, 16.0  ;;  %v4356_v53 = vmul.f32 0.5, %v4238_v51  ;;  %v4359_v22 = vmul.f32 0.70710677, %v4314_v47 }
 0x644   : > { %2959 = vrcp.f32 %v4345_v7  ;;  %v2273_v33 = vmul.f32 %v4336_v45, %v4336_v45  ;;  %v4364_v62 = vmul.f32 0.5, %v1672_v0  ;;  %v4367_v46 = vmul.f32 0.70710677, %v4320_v10 }
 0x645   : > { %v2123_v31 = vmul.f32 %v2122_v17, %v4274_v55  ;;  %v2162_v6 = vadd.f32 0.18741608, %v2161_v54  ;;  %v4370_v30 = vmul.f32 0.5, %v1673_v50  ;;  %v2173_v51 = vadd.f32 0.4994258, %v2172_v4 }
 0x646   : > { %v2199_v20 = vmul.f32 %v2198_v15, %v4284_v52  ;;  %v2208_v36 = vmul.f32 %v2207_v5, %v4284_v52  ;;  %v4375_v61 = vmul.f32 0.70710677, %v4325_v59  ;;  %v2084_v11 = vadd.f32 1.1283791, %v2083_v2 }
 0x647   : > { %v2235_v0 = vmul.f32 2.1237322e-06, %v4353_v60  ;;  %v2174_v18 = vmul.f32 %v2173_v51, %v4276_v38  ;;  %v4379_v27 = vmin.f32 %v2273_v33, 16.0  ;;  %v2313_v55 = vmul.f32 %v4359_v22, %v4359_v22 }
 0x648   : > { %v2209_v44 = vadd.f32 0.014752088, %v2208_v36  ;;  %v2124_v43 = vadd.f32 1.1283791, %v2123_v31  ;;  %v2163_v23 = vmul.f32 %v2162_v6, %v4276_v38  ;;  %v4388_v40 = vmul.f32 %v4367_v46, %v4367_v46 }
 0x649   : > { %v4383_v63 = vpop.eup %2957  ;;  %v2236_v29 = vadd.f32 0.00028619796, %v2235_v0  ;;  %v4394_v3 = vadd.f32 1.0, %v2174_v18  ;;  %v2200_v50 = vadd.f32 0.05243302, %v2199_v20  ;;  %v4398_v48 = vmul.f32 %v2084_v11, %v4244_v39 }
 0x64a   : > { %v4390_v34 = vpop.eup %2959  ;;  %v2097_v37 = vmul.f32 %v4383_v63, %v4342_v42  ;;  %v2246_v25 = vmul.f32 3.8918573e-05, %v4353_v60  ;;  %v2210_v32 = vmul.f32 %v2209_v44, %v4284_v52  ;;  %v2105_v14 = vand.u32 2147483647, %v4342_v42 }
 0x64b   : > { %v2137_v38 = vmul.f32 %v4390_v34, %v4345_v7  ;;  %v2237_v16 = vmul.f32 %v2236_v29, %v4353_v60  ;;  %2961 = vrcp.f32 %v4394_v3  ;;  %v2275_v24 = vmul.f32 2.1237322e-06, %v4379_v27 }
 0x64c   : > { %v2098_v56 = vsub.f32 1.0, %v2097_v37  ;;  %vm2101_vm6 = vweird.f32 %v4342_v42  ;;  %v2107_v57 = vand.u32 2147483648, %v4342_v42  ;;  %v2211_v49 = vadd.f32 0.112945676, %v2210_v32 }
 0x64d   : > { %v2138_v39 = vsub.f32 1.0, %v2137_v38  ;;  %v4411_v58 = vmul.f32 %v2124_v43, %v4247_v13  ;;  %v2247_v12 = vadd.f32 0.001143296, %v2246_v25  ;;  %v2286_v19 = vmul.f32 3.8918573e-05, %v4379_v27 }
 0x64e   : > { %v2099_v21 = vmul.f32 %v4383_v63, %v2098_v56  ;;  %v2201_v17 = vmul.f32 %v2200_v50, %v4284_v52  ;;  %v2212_v54 = vmul.f32 %v2211_v49, %v4284_v52  ;;  %v2238_v4 = vadd.f32 0.0036580483, %v2237_v16 }
 0x64f   : > { %v2139_v35 = vmul.f32 %v4390_v34, %v2138_v39  ;;  %vm4417_vm8 = vcmp.eq.f32.partialorder %v2105_v14, 8.507059e+37  ;;  %vm2141_vm11 = vweird.f32 %v4345_v7  ;;  %v2248_v5 = vmul.f32 %v2247_v12, %v4353_v60 }
 0x650   : > { %v2276_v13 = vadd.f32 0.00028619796, %v2275_v24  ;;  %vm2102_vm7 = vweird.f32 %v4383_v63  ;;  %v2145_v2 = vand.u32 2147483647, %v4345_v7  ;;  %v2147_v33 = vand.u32 2147483648, %v4345_v7 }
 0x651   : > { %v2213_v31 = vadd.f32 0.4994258, %v2212_v54  ;;  %v4426_v6 = vpop.eup %2961  ;;  %v2100_v51 = vadd.f32 %v4383_v63, %v2099_v21  ;;  %v2249_v20 = vadd.f32 0.014752088, %v2248_v5  ;;  %v2287_v11 = vadd.f32 0.001143296, %v2286_v19  ;;  %vm4440_vm10 = vmor %vm2101_vm6, %vm2102_vm7 }
 0x652   : > { %v2277_v36 = vmul.f32 %v2276_v13, %v4379_v27  ;;  %v2140_v0 = vadd.f32 %v4390_v34, %v2139_v35  ;;  %vm2142_vm12 = vweird.f32 %v4390_v34  ;;  %v2202_v18 = vadd.f32 0.18741608, %v2201_v17 }
 0x653   : > { %v2239_v44 = vmul.f32 %v2238_v4, %v4353_v60  ;;  %v2108_v43 = vor.u32 1.1754944e-38, %v2107_v57  ;;  %v2164_v29 = vadd.f32 1.1283791, %v2163_v23  ;;  %v2177_v37 = vmul.f32 %v4426_v6, %v4394_v3  ;;  %vm4456_vm9 = vmor %vm2141_vm11, %vm2142_vm12 }
 0x654   : > { %v2214_v50 = vmul.f32 %v2213_v31, %v4284_v52  ;;  %vm4444_vm13 = vcmp.eq.f32.partialorder %v2145_v2, 8.507059e+37  ;;  %v2148_v32 = vor.u32 1.1754944e-38, %v2147_v33  ;;  %v2250_v23 = vmul.f32 %v2249_v20, %v4353_v60 }
 0x655   : > { %v4449_v16 = vmin.f32 %v2313_v55, 16.0  ;;  %v2104_v56 = vsel %vm4440_vm10, %v4383_v63, %v2100_v51  ;;  %v2278_v24 = vadd.f32 0.0036580483, %v2277_v36  ;;  %v2288_v57 = vmul.f32 %v2287_v11, %v4379_v27 }
 0x656   : > { %v4460_v14 = vadd.f32 1.0, %v2214_v50  ;;  %v2144_v55 = vsel %vm4456_vm9, %v4390_v34, %v2140_v0  ;;  %v2203_v39 = vmul.f32 %v2202_v18, %v4284_v52  ;;  %v2240_v49 = vadd.f32 0.05243302, %v2239_v44 }
 0x657   : > { %v2251_v21 = vadd.f32 0.112945676, %v2250_v23  ;;  %v4468_v63 = vmul.f32 %v2164_v29, %v4250_v9  ;;  %v2178_v7 = vsub.f32 1.0, %v2177_v37  ;;  %v4473_v12 = vmul.f32 %v4375_v61, %v4375_v61 }
 0x658   : > { %2963 = vrcp.f32 %v4460_v14  ;;  %v2109_v19 = vsel %vm4417_vm8, %v2108_v43, %v2104_v56  ;;  %v2185_v35 = vand.u32 2147483647, %v4394_v3  ;;  %v2187_v34 = vand.u32 2147483648, %v4394_v3 }
 0x659   : > { %v2252_v52 = vmul.f32 %v2251_v21, %v4353_v60  ;;  %v2149_v9 = vsel %vm4444_vm13, %v2148_v32, %v2144_v55  ;;  %v2279_v17 = vmul.f32 %v2278_v24, %v4379_v27  ;;  %v2289_v54 = vadd.f32 0.014752088, %v2288_v57 }
 0x65a   : > { %v2315_v4 = vmul.f32 2.1237322e-06, %v4449_v16  ;;  %vm2181_vm14 = vweird.f32 %v4394_v3  ;;  %v2204_v5 = vadd.f32 1.1283791, %v2203_v39  ;;  %v2241_v15 = vmul.f32 %v2240_v49, %v4353_v60 }
 0x65b   : > { %v2253_v13 = vadd.f32 0.4994258, %v2252_v52  ;;  %v2179_v2 = vmul.f32 %v4426_v6, %v2178_v7  ;;  %v2290_v33 = vmul.f32 %v2289_v54, %v4379_v27  ;;  %v2326_v51 = vmul.f32 3.8918573e-05, %v4449_v16 }
 0x65c   : > { %v2316_v31 = vadd.f32 0.00028619796, %v2315_v4  ;;  %v4490_v20 = vmul.f32 %v2109_v19, %v4398_v48  ;;  %v4493_v36 = vmul.f32 %v2149_v9, %v4411_v58  ;;  %v2188_v11 = vor.u32 1.1754944e-38, %v2187_v34 }
 0x65d   : > { %v2254_v0 = vmul.f32 %v2253_v13, %v4353_v60  ;;  %vm4498_vm0 = vcmp.eq.f32.partialorder %v2185_v35, 8.507059e+37  ;;  %v2280_v43 = vadd.f32 0.05243302, %v2279_v17  ;;  %v2291_v29 = vadd.f32 0.112945676, %v2290_v33 }
 0x65e   : > { %v4496_v18 = vpop.eup %2963  ;;  %v2317_v37 = vmul.f32 %v2316_v31, %v4449_v16  ;;  %v2327_v50 = vadd.f32 0.001143296, %v2326_v51  ;;  %v2242_v25 = vadd.f32 0.18741608, %v2241_v15  ;;  %v4508_v38 = vmin.f32 %v4388_v40, 16.0 }
 0x65f   : > { %v2217_v48 = vmul.f32 %v4496_v18, %v4460_v14  ;;  %v4505_v58 = vadd.f32 1.0, %v2254_v0  ;;  %v2180_v32 = vadd.f32 %v4426_v6, %v2179_v2  ;;  %vm2182_vm15 = vweird.f32 %v4426_v6 }
 0x660   : > { %v2292_v23 = vmul.f32 %v2291_v29, %v4379_v27  ;;  %v2328_v56 = vmul.f32 %v2327_v50, %v4449_v16  ;;  %v4515_v42 = vmul.f32 %v2204_v5, %v4255_v26  ;;  %v2318_v57 = vadd.f32 0.0036580483, %v2317_v37  ;;  %vm4524_vm1 = vmor %vm2181_vm14, %vm2182_vm15 }
 0x661   : > { %v2218_v24 = vsub.f32 1.0, %v2217_v48  ;;  %2965 = vrcp.f32 %v4505_v58  ;;  %v2773_v55 = vclamps-f32 %v4490_v20, 1.0  ;;  %v2225_v40 = vand.u32 2147483647, %v4460_v14 }
 0x662   : > { %v2281_v39 = vmul.f32 %v2280_v43, %v4379_v27  ;;  %v2293_v49 = vadd.f32 0.4994258, %v2292_v23  ;;  %v2774_v21 = vclamps-f32 %v4493_v36, 1.0  ;;  %v2243_v26 = vmul.f32 %v2242_v25, %v4353_v60 }
 0x663   : > { %v2329_v19 = vadd.f32 0.014752088, %v2328_v56  ;;  %v2355_v35 = vmul.f32 2.1237322e-06, %v4508_v38  ;;  %v2184_v34 = vsel %vm4524_vm1, %v4426_v6, %v2180_v32  ;;  %v2219_v52 = vmul.f32 %v4496_v18, %v2218_v24 }
 0x664   : > { %v2227_v9 = vand.u32 2147483648, %v4460_v14  ;;  %v2294_v17 = vmul.f32 %v2293_v49, %v4379_v27  ;;  %v2319_v3 = vmul.f32 %v2318_v57, %v4449_v16  ;;  %v2366_v60 = vmul.f32 3.8918573e-05, %v4508_v38 }
 0x665   : > { %v2330_v54 = vmul.f32 %v2329_v19, %v4449_v16  ;;  %v2356_v4 = vadd.f32 0.00028619796, %v2355_v35  ;;  %vm2221_vm2 = vweird.f32 %v4460_v14  ;;  %vm4540_vm3 = vcmp.eq.f32.partialorder %v2225_v40, 8.507059e+37 }
 0x666   : > { %v2282_v6 = vadd.f32 0.18741608, %v2281_v39  ;;  %v4544_v15 = vadd.f32 1.0, %v2294_v17  ;;  %v2189_v2 = vsel %vm4498_vm0, %v2188_v11, %v2184_v34  ;;  %v2244_v33 = vadd.f32 1.1283791, %v2243_v26 }
 0x667   : > { %v2966_v13 = vpop.eup %2965  ;;  %v2331_v31 = vadd.f32 0.112945676, %v2330_v54  ;;  %v2367_v51 = vadd.f32 0.001143296, %v2366_v60  ;;  %v2220_v0 = vadd.f32 %v4496_v18, %v2219_v52  ;;  %vm2222_vm4 = vweird.f32 %v4496_v18 }
 0x668   : > { %v2257_v43 = vmul.f32 %v2966_v13, %v4505_v58  ;;  %2967 = vrcp.f32 %v4544_v15  ;;  %v2228_v29 = vor.u32 1.1754944e-38, %v2227_v9  ;;  %v2320_v37 = vadd.f32 0.05243302, %v2319_v3  ;;  %vm4563_vm5 = vmor %vm2221_vm2, %vm2222_vm4 }
 0x669   : > { %v2357_v50 = vmul.f32 %v2356_v4, %v4508_v38  ;;  %v4554_v48 = vmin.f32 %v4473_v12, 16.0  ;;  %v4557_v11 = vmul.f32 %v2189_v2, %v4468_v63  ;;  %v2283_v25 = vmul.f32 %v2282_v6, %v4379_v27 }
 0x66a   : > { %v2258_v44 = vsub.f32 1.0, %v2257_v43  ;;  %v2332_v32 = vmul.f32 %v2331_v31, %v4449_v16  ;;  %v2245_v56 = vmul.f32 %v2244_v33, %v4306_v8  ;;  %vm2261_vm6 = vweird.f32 %v4505_v58 }
 0x66b   : > { %v2267_v12 = vand.u32 2147483648, %v4505_v58  ;;  %v2368_v63 = vmul.f32 %v2367_v51, %v4508_v38  ;;  %v2224_v27 = vsel %vm4563_vm5, %v4496_v18, %v2220_v0  ;;  %vm2262_vm8 = vweird.f32 %v2966_v13 }
 0x66c   : > { %v2259_v24 = vmul.f32 %v2966_v13, %v2258_v44  ;;  %v2333_v57 = vadd.f32 0.4994258, %v2332_v32  ;;  %v2321_v14 = vmul.f32 %v2320_v37, %v4449_v16  ;;  %v2358_v40 = vadd.f32 0.0036580483, %v2357_v50  ;;  %vm4582_vm11 = vmor %vm2261_vm6, %vm2262_vm8 }
 0x66d   : > { %v2369_v39 = vadd.f32 0.014752088, %v2368_v63  ;;  %v2395_v49 = vmul.f32 2.1237322e-06, %v4554_v48  ;;  %v2265_v26 = vand.u32 2147483647, %v4505_v58  ;;  %v2229_v34 = vsel %vm4540_vm3, %v2228_v29, %v2224_v27 }
 0x66e   : > { %v2968_v8 = vpop.eup %2967  ;;  %v2260_v7 = vadd.f32 %v2966_v13, %v2259_v24  ;;  %v2284_v19 = vadd.f32 1.1283791, %v2283_v25  ;;  %v2334_v35 = vmul.f32 %v2333_v57, %v4449_v16  ;;  %v2268_v52 = vor.u32 1.1754944e-38, %v2267_v12 }
 0x66f   : > { %v2297_v9 = vmul.f32 %v2968_v8, %v4544_v15  ;;  %v2370_v17 = vmul.f32 %v2369_v39, %v4508_v38  ;;  %v2396_v4 = vadd.f32 0.00028619796, %v2395_v49  ;;  %v2406_v60 = vmul.f32 3.8918573e-05, %v4554_v48 }
 0x670   : > { %v2264_v3 = vsel %vm4582_vm11, %v2966_v13, %v2260_v7  ;;  %v4590_v54 = vadd.f32 1.0, %v2334_v35  ;;  %v2322_v6 = vadd.f32 0.18741608, %v2321_v14  ;;  %v2359_v58 = vmul.f32 %v2358_v40, %v4508_v38 }
 0x671   : > { %v2298_v5 = vsub.f32 1.0, %v2297_v9  ;;  %v2371_v2 = vadd.f32 0.112945676, %v2370_v17  ;;  %vm2266_vm7 = vcmp.eq.f32.partialorder %v2265_v26, 8.507059e+37  ;;  %v2305_v33 = vand.u32 2147483647, %v4544_v15 }
 0x672   : > { %v2307_v31 = vand.u32 2147483648, %v4544_v15  ;;  %2969 = vrcp.f32 %v4590_v54  ;;  %v2269_v51 = vsel %vm2266_vm7, %v2268_v52, %v2264_v3  ;;  %vm2302_vm12 = vweird.f32 %v2968_v8 }
 0x673   : > { %v2299_v0 = vmul.f32 %v2968_v8, %v2298_v5  ;;  %v2372_v13 = vmul.f32 %v2371_v2, %v4508_v38  ;;  %v2230_v43 = vmul.f32 %v2229_v34, %v4515_v42  ;;  %vm2301_vm10 = vweird.f32 %v4544_v15 }
 0x674   : > { %v2397_v29 = vmul.f32 %v2396_v4, %v4554_v48  ;;  %v2407_v37 = vadd.f32 0.001143296, %v2406_v60  ;;  %v2323_v44 = vmul.f32 %v2322_v6, %v4449_v16  ;;  %v2360_v25 = vadd.f32 0.05243302, %v2359_v58  ;;  %vm2303_vm13 = vmor %vm2301_vm10, %vm2302_vm12 }
 0x675   : > { %v2300_v50 = vadd.f32 %v2968_v8, %v2299_v0  ;;  %v2373_v32 = vadd.f32 0.4994258, %v2372_v13  ;;  %v2775_v23 = vclamps-f32 %v4557_v11, 1.0  ;;  %v2270_v12 = vmul.f32 %v2269_v51, %v2245_v56 }
 0x676   : > { %v2308_v63 = vor.u32 1.1754944e-38, %v2307_v31  ;;  %v2408_v27 = vmul.f32 %v2407_v37, %v4554_v48  ;;  %v2285_v24 = vmul.f32 %v2284_v19, %v4336_v45  ;;  %vm2306_vm9 = vcmp.eq.f32.partialorder %v2305_v33, 8.507059e+37 }
 0x677   : > { %v2304_v42 = vsel %vm2303_vm13, %v2968_v8, %v2300_v50  ;;  %v2374_v15 = vmul.f32 %v2373_v32, %v4508_v38  ;;  %v2776_v14 = vclamps-f32 %v2230_v43, 1.0  ;;  %v2398_v39 = vadd.f32 0.0036580483, %v2397_v29 }
 0x678   : > { %v2970_v57 = vpop.eup %2969  ;;  %v2309_v40 = vsel %vm2306_vm9, %v2308_v63, %v2304_v42  ;;  %v2409_v16 = vadd.f32 0.014752088, %v2408_v27  ;;  %v2324_v7 = vadd.f32 1.1283791, %v2323_v44  ;;  %v2361_v56 = vmul.f32 %v2360_v25, %v4508_v38 }
 0x679   : > { %v2310_v49 = vmul.f32 %v2309_v40, %v2285_v24  ;;  %v2337_v11 = vmul.f32 %v2970_v57, %v4590_v54  ;;  %v2777_v26 = vclamps-f32 %v2270_v12, 1.0  ;;  %v2345_v35 = vand.u32 2147483647, %v4590_v54 }
 0x67a   : > { %v4609_v34 = vadd.f32 1.0, %v2374_v15  ;;  %v2410_v45 = vmul.f32 %v2409_v16, %v4554_v48  ;;  %vm2341_vm14 = vweird.f32 %v4590_v54  ;;  %v2347_v18 = vand.u32 2147483648, %v4590_v54 }
 0x67b   : > { %v2778_v8 = vclamps-f32 %v2310_v49, 1.0  ;;  %v2338_v19 = vsub.f32 1.0, %v2337_v11  ;;  %v2399_v52 = vmul.f32 %v2398_v39, %v4554_v48  ;;  %v2442_v9 = vadd.f32 1.0, %v2773_v55 }
 0x67c   : > { %2971 = vrcp.f32 %v4609_v34  ;;  %v2443_v17 = vadd.f32 1.0, %v2774_v21  ;;  %vm2342_vm0 = vweird.f32 %v2970_v57  ;;  %v2411_v4 = vadd.f32 0.112945676, %v2410_v45 }
 0x67d   : > { %v2339_v3 = vmul.f32 %v2970_v57, %v2338_v19  ;;  %v2444_v60 = vadd.f32 1.0, %v2775_v23  ;;  %vm4620_vm15 = vcmp.eq.f32.partialorder %v2345_v35, 8.507059e+37  ;;  %v2362_v6 = vadd.f32 0.18741608, %v2361_v56  ;;  %vm2343_vm1 = vmor %vm2341_vm14, %vm2342_vm0 }
 0x67e   : > { %v2445_v58 = vadd.f32 1.0, %v2776_v14  ;;  %v2446_v2 = vadd.f32 1.0, %v2777_v26  ;;  %v2348_v31 = vor.u32 1.1754944e-38, %v2347_v18  ;;  %v2412_v51 = vmul.f32 %v2411_v4, %v4554_v48 }
 0x67f   : > { %v2340_v33 = vadd.f32 %v2970_v57, %v2339_v3  ;;  %v2447_v20 = vadd.f32 1.0, %v2778_v8  ;;  %v2460_v36 = vmul.f32 %v2442_v9, %v4334_v41  ;;  %v2461_v55 = vmul.f32 %v2443_v17, %v4340_v28 }
 0x680   : > { %v2462_v21 = vmul.f32 %v2444_v60, %v4349_v1  ;;  %v2463_v0 = vmul.f32 %v2445_v58, %v4356_v53  ;;  %v2400_v43 = vadd.f32 0.05243302, %v2399_v52  ;;  %v2413_v29 = vadd.f32 0.4994258, %v2412_v51 }
 0x681   : > { %v2344_v13 = vsel %vm2343_vm1, %v2970_v57, %v2340_v33  ;;  %v2464_v37 = vmul.f32 %v2446_v2, %v4364_v62  ;;  %v2465_v41 = vmul.f32 %v2447_v20, %v4370_v30  ;;  %v2474_v44 = vpack.c.bf16 %v2461_v55, %v2460_v36 }
 0x682   : > { %v2972_v50 = vpop.eup %2971  ;;  %v2349_v54 = vsel %vm4620_vm15, %v2348_v31, %v2344_v13  ;;  %v2475_v28 = vpack.c.bf16 %v2463_v0, %v2462_v21  ;;  %v2325_v1 = vmul.f32 %v2324_v7, %v4359_v22  ;;  %v2363_v25 = vmul.f32 %v2362_v6, %v4508_v38 }
 0x683   : > { %v2377_v53 = vmul.f32 %v2972_v50, %v4609_v34  ;;  %v2414_v32 = vmul.f32 %v2413_v29, %v4554_v48  ;;  %v2476_v23 = vpack.c.bf16 %v2465_v41, %v2464_v37  ;;  %2484 = vst [vmem:[%s4205_s26 + $0x24] sm:$0xff] %v2474_v44  ;;  %v2387_v63 = vand.u32 2147483648, %v4609_v34 }
 0x684   : > { %v2350_v62 = vmul.f32 %v2349_v54, %v2325_v1  ;;  %2485 = vst [vmem:[%s4205_s26 + $0x2c] sm:$0xff] %v2475_v28  ;;  %v2401_v27 = vmul.f32 %v2400_v43, %v4554_v48  ;;  %v2364_v24 = vadd.f32 1.1283791, %v2363_v25  ;;  %vm2382_vm2 = vweird.f32 %v2972_v50 }
 0x685   : > { %v2378_v12 = vsub.f32 1.0, %v2377_v53  ;;  %v2415_v30 = vadd.f32 1.0, %v2414_v32  ;;  %2486 = vst [vmem:[%s4205_s26 + $0x34] sm:$0xff] %v2476_v23  ;;  %v2385_v22 = vand.u32 2147483647, %v4609_v34  ;;  %vm2381_vm3 = vweird.f32 %v4609_v34 }
 0x686   : > { %v2779_v38 = vclamps-f32 %v2350_v62, 1.0  ;;  %vm2383_vm4 = vmor %vm2381_vm3, %vm2382_vm2  ;;  %v2388_v57 = vor.u32 1.1754944e-38, %v2387_v63  ;;  %v2402_v14 = vadd.f32 0.18741608, %v2401_v27  ;;  %v2365_v40 = vmul.f32 %v2364_v24, %v4367_v46 }
 0x687   : > { %v2379_v42 = vmul.f32 %v2972_v50, %v2378_v12  ;;  %2973 = vrcp.f32 %v2415_v30  ;;  %vm2386_vm5 = vcmp.eq.f32.partialorder %v2385_v22, 8.507059e+37  ;;  %v1692_v26 = vmul.f32 0.5, %v4314_v47 }
 0x688   : > { %v2448_v7 = vadd.f32 1.0, %v2779_v38  ;;  %v2403_v56 = vmul.f32 %v2402_v14, %v4554_v48  ;;  %v1693_v34 = vmul.f32 0.5, %v4320_v10  ;;  %v2427_v52 = vand.u32 2147483648, %v2415_v30 }
 0x689   : > { %v2380_v15 = vadd.f32 %v2972_v50, %v2379_v42  ;;  %v2425_v17 = vand.u32 2147483647, %v2415_v30  ;;  %vm2421_vm8 = vweird.f32 %v2415_v30  ;;  %v1694_v2 = vmul.f32 0.5, %v4325_v59 }
 0x68a   : > { %v2466_v18 = vmul.f32 %v2448_v7, %v1692_v26  ;;  %v2404_v46 = vadd.f32 1.1283791, %v2403_v56  ;;  %v2428_v47 = vor.u32 1.1754944e-38, %v2427_v52 }
 0x68b   : > { %v2384_v39 = vsel %vm2383_vm4, %v2972_v50, %v2380_v15  ;;  %vm2426_vm7 = vcmp.eq.f32.partialorder %v2425_v17, 8.507059e+37 }
 0x68c   : > { %v2389_v16 = vsel %vm2386_vm5, %v2388_v57, %v2384_v39  ;;  %v2405_v60 = vmul.f32 %v2404_v46, %v4375_v61 }
 0x68d   : > { %v2390_v49 = vmul.f32 %v2389_v16, %v2365_v40  ;;  %v2974_v11 = vpop.eup %2973 }
 0x68e   : > { %v2417_v45 = vmul.f32 %v2974_v11, %v2415_v30  ;;  %vm2422_vm6 = vweird.f32 %v2974_v11 }
 0x68f   : > { %v2780_v35 = vclamps-f32 %v2390_v49, 1.0  ;;  %vm2423_vm11 = vmor %vm2421_vm8, %vm2422_vm6 }
 0x690   : > { %v2418_v8 = vsub.f32 1.0, %v2417_v45 }
 0x691   : > { %v2449_v19 = vadd.f32 1.0, %v2780_v35 }
 0x692   : > { %v2419_v9 = vmul.f32 %v2974_v11, %v2418_v8 }
 0x693   : > { %v2467_v3 = vmul.f32 %v2449_v19, %v1693_v34 }
 0x694   : > { %v2420_v4 = vadd.f32 %v2974_v11, %v2419_v9 }
 0x695   : > { %v2477_v48 = vpack.c.bf16 %v2467_v3, %v2466_v18 }
 0x696   : > { %v2424_v10 = vsel %vm2423_vm11, %v2974_v11, %v2420_v4 }
 0x697   : > { %2487 = vst [vmem:[%s4205_s26 + $0x3c] sm:$0xff] %v2477_v48  ;;  %v2429_v5 = vsel %vm2426_vm7, %v2428_v47, %v2424_v10 }
 0x698   : > { %v2430_v6 = vmul.f32 %v2429_v5, %v2405_v60 }
 0x69a   : > { %v2781_v58 = vclamps-f32 %v2430_v6, 1.0 }
 0x69c   : > { %v2450_v33 = vadd.f32 1.0, %v2781_v58 }
 0x69e   : > { %v2468_v31 = vmul.f32 %v2450_v33, %v1694_v2 }
 0x6a0   : > { %v2478_v61 = vpack.c.bf16 %v2468_v31, %v2468_v31 }
 0x6a2   : > { %2488 = vst [vmem:[%s4205_s26 + $0x44] sm:$0xf] %v2478_v61 }
 0x6a3   : > { %3032 = shalt.err (!%p3029_p7)
}
 0x6a4   : > { %s3080_s27 = smov 576   ;;  %s3081_s17 = smov 36  }
 0x6a5   : > { %2843 = dma.vmem_to_hbm [thread:$0]  (%p3178_p11), %s2503_s18, 1152, %s2505_s13, %s2490_s19, %s3080_s27, %s3080_s27, %s3081_s17  }
 0x6a6 PF: > { %s2519_s22 = sand.u32 1, %s3059_s30   ;;  %p2850_p8 = pnand %p2580_p9, %p3182_p12 }
 0x6a7   : > { %s2520_s25 = scalar_lea.sflag [#allocation4], %s2519_s22 }
 0x6a8   : > { %p2851_p10 = pneg %p2850_p8 }
 0x6aa   : > { %3054 = dma.done.wait (%p2851_p10), %s2520_s25, 1152  }
 0x6ab   : > { %3056 = vsyncadd (%p2851_p10), %s2520_s25, 4294966144  ;;  %s4777_s12 = sld [smem:[#allocation9_spill]]  ;;  %s4780_s30 = smov %s3063_s10 }
 0x6ac   : > { %s4778_s24 = sld [smem:[#allocation8_spill]] }
 0x6ad   : > { %s4779_s11 = sld [smem:[#allocation10_spill]] }
 0x6b1   : > { %p22_p0 = scmp.ge.s32.totalorder %s4777_s12, 4  }
 0x6b2   : > { %s4781_s10 = smov %s4778_s24 }
 0x6b3   :  { %24 = sbr.rel (!%p22_p0) target bundleno = 5 (0x5), region = 101 }
 0x6b8   :  { %2526 = vsyncpa [#allocation3], 1 }
 0x6b9   :  { %2528 = vsyncpa [#allocation3 + $0x1], 1 }
 0x6ba   :  { %2529 = vsyncpa [#allocation4], 1 }
 0x6bb   :  { %2531 = vsyncpa [#allocation4 + $0x1], 1 }

</bundles_post_ra>
